<compile_context>
chip_gen: v6e
topology: v6e:2x2x1
jax: 0.10.0
libtpu: 0.0.40
codegen_flags: <defaults>
</compile_context>

<pallas_src>
import functools

import jax
import jax.numpy as jnp
from jax.experimental import pallas as pl
from jax.experimental.pallas import tpu as pltpu

LANE = 128


def _round_up(x, m):
    return (x + m - 1) // m * m


def _pad2(a, rows, cols):
    r, c = a.shape
    return jnp.pad(a, ((0, rows - r), (0, cols - c)))


def chebnet_fused_kernel(lhat_ref, x_ref, w10_ref, w11_ref, b1_ref,
                         w20_ref, w21_ref, b2_ref, out_ref,
                         t0_sc, t1_sc, *, num_classes, tile_m):
    """Fused ChebNet forward: grid = (phase, row_tile), phase-major order."""
    phase = pl.program_id(0)
    i = pl.program_id(1)
    row0 = pl.multiple_of(i * tile_m, tile_m)

    # Rows of the resident L_hat needed by this tile (used in both phases).
    lhat_rows = lhat_ref[pl.ds(row0, tile_m), :]          # (TM, Np)  bf16

    @pl.when(phase == 0)
    def _():
        # T1 = L_hat_rows @ X (MXU, f32 accumulation)
        tx = jnp.dot(lhat_rows, x_ref[...], preferred_element_type=jnp.float32)
        x_tile = x_ref[pl.ds(row0, tile_m), :]            # T0 term rows (bf16)
        # Two Chebyshev dots + bias; no in-kernel concatenate / column split.
        h = (jnp.dot(x_tile, w10_ref[...], preferred_element_type=jnp.float32)
             + jnp.dot(tx.astype(jnp.bfloat16), w11_ref[...],
                       preferred_element_type=jnp.float32)
             + b1_ref[...])
        h = jnp.maximum(h, 0.0)                           # ReLU (f32 VPU)
        # dropout: module evaluated in inference mode -> identity
        # TODO(synk): training-mode dropout (Bernoulli mask via pltpu.prng_*) not emitted.
        hb = h.astype(jnp.bfloat16)
        t0 = jnp.dot(hb, w20_ref[...], preferred_element_type=jnp.float32)
        t1 = jnp.dot(hb, w21_ref[...], preferred_element_type=jnp.float32)
        t0_sc[pl.ds(row0, tile_m), :] = t0                # stays in VMEM
        t1_sc[pl.ds(row0, tile_m), :] = t1                # stays in VMEM
        # Keep the output buffer defined for this step; overwritten in phase 1.
        out_ref[...] = t0

    @pl.when(phase == 1)
    def _():
        # y = t0 + L_hat_rows @ t1_all + b2
        y = (t0_sc[pl.ds(row0, tile_m), :]
             + jnp.dot(lhat_rows, t1_sc[...].astype(jnp.bfloat16),
                       preferred_element_type=jnp.float32)
             + b2_ref[...])
        # Mask lane-padded class columns out of the softmax.
        col = jax.lax.broadcasted_iota(jnp.int32, y.shape, 1)
        y = jnp.where(col < num_classes, y, -1e30)
        m = jnp.max(y, axis=1, keepdims=True)
        z = y - m
        lse = jnp.log(jnp.sum(jnp.exp(z), axis=1, keepdims=True))
        out_ref[...] = z - lse


def chebnet_forward(lhat, x, w10, w11, b1, w20, w21, b2, *, tile_m=128):
    n, f = x.shape
    h_dim = w10.shape[1]
    c = w20.shape[1]

    fp = _round_up(f, LANE)
    hp = _round_up(h_dim, LANE)
    cp = _round_up(c, LANE)

    # Row tile: multiple of 32 (safe sublane offset for all packed dtypes).
    tile_m = _round_up(min(tile_m, _round_up(n, 32)), 32)
    np_ = _round_up(n, tile_m)
    num_tiles = np_ // tile_m

    # --- pad + cast once in the wrapper (zero kernel cost) ---
    lhat_p = _pad2(lhat, np_, np_).astype(jnp.bfloat16)
    x_p = _pad2(x, np_, fp).astype(jnp.bfloat16)
    w10p = _pad2(w10, fp, hp).astype(jnp.bfloat16)
    w11p = _pad2(w11, fp, hp).astype(jnp.bfloat16)
    w20p = _pad2(w20, hp, cp).astype(jnp.bfloat16)
    w21p = _pad2(w21, hp, cp).astype(jnp.bfloat16)
    b1p = _pad2(b1.reshape(1, -1).astype(jnp.float32), 1, hp)
    b2p = _pad2(b2.reshape(1, -1).astype(jnp.float32), 1, cp)

    # Explicit scoped-VMEM budget (inputs + out tile + scratch, x2 headroom for
    # pipeline buffers), clamped under v7x's 64 MiB physical VMEM.
    est = (np_ * np_ * 2 + np_ * fp * 2                    # L_hat, X (bf16)
           + 2 * fp * hp * 2 + 2 * hp * cp * 2 + hp * 4 + cp * 4
           + tile_m * cp * 4                               # output tile
           + 2 * np_ * cp * 4)                             # t0/t1 scratch (f32)
    vmem_limit = int(min(max(2 * est, 16 << 20), 48 << 20))

    const = lambda p, i: (0, 0)
    kernel = functools.partial(chebnet_fused_kernel, num_classes=c, tile_m=tile_m)

    out_p = pl.pallas_call(
        kernel,
        out_shape=jax.ShapeDtypeStruct((np_, cp), jnp.float32),
        grid_spec=pltpu.PrefetchScalarGridSpec(
            num_scalar_prefetch=0,
            grid=(2, num_tiles),                           # (phase, row tile)
            in_specs=[pl.BlockSpec((np_, np_), const),     # L_hat (resident, read once)
                      pl.BlockSpec((np_, fp), const),      # X     (resident)
                      pl.BlockSpec((fp, hp), const),       # W10
                      pl.BlockSpec((fp, hp), const),       # W11
                      pl.BlockSpec((1, hp), const),        # b1
                      pl.BlockSpec((hp, cp), const),       # W20
                      pl.BlockSpec((hp, cp), const),       # W21
                      pl.BlockSpec((1, cp), const)],       # b2
            out_specs=pl.BlockSpec((tile_m, cp), lambda p, i: (i, 0)),
            scratch_shapes=[pltpu.VMEM((np_, cp), jnp.float32),   # t0 = h @ W20
                            pltpu.VMEM((np_, cp), jnp.float32)],  # t1 = h @ W21
        ),
        compiler_params=pltpu.CompilerParams(
            dimension_semantics=("arbitrary", "arbitrary"),
            vmem_limit_bytes=vmem_limit),
    )(lhat_p, x_p, w10p, w11p, b1p, w20p, w21p, b2p)

    return out_p[:n, :c]


def build_scaled_laplacian(edge_index, num_nodes):
    """Dense L_hat = 2L/lambda_max - I with sym norm, lambda_max=2.0 (PyG ChebConv
    defaults -> L_hat = -D^-1/2 A D^-1/2).  Plain-JAX glue, not in the kernel.
    Note: duplicate edges are clamped to 1 (PyG would sum them)."""
    src, dst = edge_index[0], edge_index[1]
    keep = (src != dst).astype(jnp.float32)           # ChebConv removes self loops
    a = jnp.zeros((num_nodes, num_nodes), jnp.float32)
    a = a.at[src, dst].add(keep)
    a = jnp.minimum(a, 1.0)                           # binary adjacency (dedupe)
    deg = a.sum(axis=1)
    dinv = jnp.where(deg > 0, jax.lax.rsqrt(deg), 0.0)
    a_norm = dinv[:, None] * a * dinv[None, :]
    lam_max = 2.0
    eye = jnp.eye(num_nodes, dtype=jnp.float32)
    return (2.0 / lam_max) * (eye - a_norm) - eye


def chebnet_reference(lhat, x, w10, w11, b1, w20, w21, b2):
    """Pure-JAX f32 reference with the original association order."""
    h = jnp.maximum(x @ w10 + (lhat @ x) @ w11 + b1, 0.0)
    y = h @ w20 + (lhat @ h) @ w21 + b2
    return jax.nn.log_softmax(y, axis=1)


def glorot(key, shape):
    fan_in, fan_out = shape[0], shape[1]
    limit = jnp.sqrt(6.0 / (fan_in + fan_out))
    return jax.random.uniform(key, shape, jnp.float32, -limit, limit)


if __name__ == "__main__":
    # Small synthetic graph: N nodes, F features, hidden 32 (fixed by module), C classes.
    N, F, H, C = 256, 16, 32, 8

    key = jax.random.PRNGKey(0)
    k_x, k_e1, k_e2, k_w10, k_w11, k_w20, k_w21 = jax.random.split(key, 7)

    x = jax.random.normal(k_x, (N, F), jnp.float32)

    # Random edges, symmetrized; self loops removed in the Laplacian builder.
    E = 1024
    src = jax.random.randint(k_e1, (E,), 0, N)
    dst = jax.random.randint(k_e2, (E,), 0, N)
    edge_index = jnp.stack([jnp.concatenate([src, dst]),
                            jnp.concatenate([dst, src])], axis=0)

    lhat = build_scaled_laplacian(edge_index, N)

    # ChebConv parameters: K=2 -> two weight matrices per layer, glorot init, zero bias.
    w1_0 = glorot(k_w10, (F, H))
    w1_1 = glorot(k_w11, (F, H))
    b1 = jnp.zeros((H,), jnp.float32)
    w2_0 = glorot(k_w20, (H, C))
    w2_1 = glorot(k_w21, (H, C))
    b2 = jnp.zeros((C,), jnp.float32)

    # tile_m=128 -> grid (2 phases, 2 row tiles): exercises the multi-tile /
    # dynamic-offset path.  For large graphs bump tile_m (the fused design makes
    # per-step L_hat DMA moot, so tile_m only amortizes per-step overhead).
    out = chebnet_forward(lhat, x, w1_0, w1_1, b1, w2_0, w2_1, b2, tile_m=128)
    out = jax.block_until_ready(out)

    assert out.shape == (N, C)
    # rows are valid log-probabilities
    assert bool(jnp.allclose(jnp.exp(out).sum(axis=1), 1.0, atol=1e-4))
    # matches pure-JAX f32 reference up to bf16-matmul / reassociation error
    ref = chebnet_reference(lhat, x, w1_0, w1_1, b1, w2_0, w2_1, b2)
    assert bool(jnp.allclose(out, ref, atol=0.15))

    print("KERNEL_OK")
</pallas_src>

<mosaic_0001>
module attributes {stable_mosaic.version = 11 : i64} {
  func.func @chebnet_fused_kernel(%arg0: i32, %arg1: i32, %arg2: memref<256x256xbf16, #tpu.memory_space<vmem>>, %arg3: memref<256x128xbf16, #tpu.memory_space<vmem>>, %arg4: memref<128x128xbf16, #tpu.memory_space<vmem>>, %arg5: memref<128x128xbf16, #tpu.memory_space<vmem>>, %arg6: memref<1x128xf32, #tpu.memory_space<vmem>>, %arg7: memref<128x128xbf16, #tpu.memory_space<vmem>>, %arg8: memref<128x128xbf16, #tpu.memory_space<vmem>>, %arg9: memref<1x128xf32, #tpu.memory_space<vmem>>, %arg10: memref<128x128xf32, #tpu.memory_space<vmem>>, %arg11: memref<256x128xf32, #tpu.memory_space<vmem>>, %arg12: memref<256x128xf32, #tpu.memory_space<vmem>>) attributes {dimension_semantics = [#tpu.dimension_semantics<arbitrary>, #tpu.dimension_semantics<arbitrary>], iteration_bounds = array<i64: 2, 2>, scalar_prefetch = 0 : i64, scratch_operands = 2 : i64, tpu.core_type = #tpu.core_type<tc>, window_params = [{pipeline_mode = #tpu.pipeline_mode<synchronous>, transform_indices = @transform_0, window_bounds = array<i64: 256, 256>}, {pipeline_mode = #tpu.pipeline_mode<synchronous>, transform_indices = @transform_1, window_bounds = array<i64: 256, 128>}, {pipeline_mode = #tpu.pipeline_mode<synchronous>, transform_indices = @transform_2, window_bounds = array<i64: 128, 128>}, {pipeline_mode = #tpu.pipeline_mode<synchronous>, transform_indices = @transform_3, window_bounds = array<i64: 128, 128>}, {pipeline_mode = #tpu.pipeline_mode<synchronous>, transform_indices = @transform_4, window_bounds = array<i64: 1, 128>}, {pipeline_mode = #tpu.pipeline_mode<synchronous>, transform_indices = @transform_5, window_bounds = array<i64: 128, 128>}, {pipeline_mode = #tpu.pipeline_mode<synchronous>, transform_indices = @transform_6, window_bounds = array<i64: 128, 128>}, {pipeline_mode = #tpu.pipeline_mode<synchronous>, transform_indices = @transform_7, window_bounds = array<i64: 1, 128>}, {transform_indices = @transform_8, window_bounds = array<i64: 128, 128>}]} {
    %c128_i32 = arith.constant 128 : i32
    %0 = arith.muli %arg1, %c128_i32 : i32
    %1 = tpu.assume_multiple %0, 128 : i32
    %2 = arith.index_cast %1 : i32 to index
    %c0 = arith.constant 0 : index
    %3 = vector.load %arg2[%2, %c0] : memref<256x256xbf16, #tpu.memory_space<vmem>>, vector<128x256xbf16>
    %c0_i32 = arith.constant 0 : i32
    %4 = arith.cmpi eq, %arg0, %c0_i32 : i32
    %5 = arith.extui %4 : i1 to i32
    %c0_i32_0 = arith.constant 0 : i32
    %6 = arith.cmpi ne, %5, %c0_i32_0 : i32
    scf.if %6 {
      %c0_2 = arith.constant 0 : index
      %c0_3 = arith.constant 0 : index
      %10 = vector.load %arg3[%c0_2, %c0_3] : memref<256x128xbf16, #tpu.memory_space<vmem>>, vector<256x128xbf16>
      %cst = arith.constant dense<0.000000e+00> : vector<128x128xf32>
      %11 = tpu.matmul %3, %10, %cst {dimension_numbers = #tpu.dot_dimension_numbers<[1], [0], [0], [1], [0, 0, 1, 1], [], []>} : vector<128x256xbf16>, vector<256x128xbf16>, vector<128x128xf32> -> vector<128x128xf32>
      %12 = arith.index_cast %1 : i32 to index
      %c0_4 = arith.constant 0 : index
      %13 = vector.load %arg3[%12, %c0_4] : memref<256x128xbf16, #tpu.memory_space<vmem>>, vector<128x128xbf16>
      %c0_5 = arith.constant 0 : index
      %c0_6 = arith.constant 0 : index
      %14 = vector.load %arg4[%c0_5, %c0_6] : memref<128x128xbf16, #tpu.memory_space<vmem>>, vector<128x128xbf16>
      %cst_7 = arith.constant dense<0.000000e+00> : vector<128x128xf32>
      %15 = tpu.matmul %13, %14, %cst_7 {dimension_numbers = #tpu.dot_dimension_numbers<[1], [0], [0], [1], [0, 0, 1, 1], [], []>} : vector<128x128xbf16>, vector<128x128xbf16>, vector<128x128xf32> -> vector<128x128xf32>
      %16 = arith.truncf %11 : vector<128x128xf32> to vector<128x128xbf16>
      %c0_8 = arith.constant 0 : index
      %c0_9 = arith.constant 0 : index
      %17 = vector.load %arg5[%c0_8, %c0_9] : memref<128x128xbf16, #tpu.memory_space<vmem>>, vector<128x128xbf16>
      %cst_10 = arith.constant dense<0.000000e+00> : vector<128x128xf32>
      %18 = tpu.matmul %16, %17, %cst_10 {dimension_numbers = #tpu.dot_dimension_numbers<[1], [0], [0], [1], [0, 0, 1, 1], [], []>} : vector<128x128xbf16>, vector<128x128xbf16>, vector<128x128xf32> -> vector<128x128xf32>
      %19 = arith.addf %15, %18 : vector<128x128xf32>
      %c0_11 = arith.constant 0 : index
      %c0_12 = arith.constant 0 : index
      %20 = vector.load %arg6[%c0_11, %c0_12] : memref<1x128xf32, #tpu.memory_space<vmem>>, vector<1x128xf32>
      %21 = vector.broadcast %20 : vector<1x128xf32> to vector<128x128xf32>
      %22 = arith.addf %19, %21 : vector<128x128xf32>
      %cst_13 = arith.constant 0.000000e+00 : f32
      %23 = vector.broadcast %cst_13 : f32 to vector<128x128xf32>
      %24 = arith.maximumf %22, %23 : vector<128x128xf32>
      %25 = arith.truncf %24 : vector<128x128xf32> to vector<128x128xbf16>
      %c0_14 = arith.constant 0 : index
      %c0_15 = arith.constant 0 : index
      %26 = vector.load %arg7[%c0_14, %c0_15] : memref<128x128xbf16, #tpu.memory_space<vmem>>, vector<128x128xbf16>
      %cst_16 = arith.constant dense<0.000000e+00> : vector<128x128xf32>
      %27 = tpu.matmul %25, %26, %cst_16 {dimension_numbers = #tpu.dot_dimension_numbers<[1], [0], [0], [1], [0, 0, 1, 1], [], []>} : vector<128x128xbf16>, vector<128x128xbf16>, vector<128x128xf32> -> vector<128x128xf32>
      %c0_17 = arith.constant 0 : index
      %c0_18 = arith.constant 0 : index
      %28 = vector.load %arg8[%c0_17, %c0_18] : memref<128x128xbf16, #tpu.memory_space<vmem>>, vector<128x128xbf16>
      %cst_19 = arith.constant dense<0.000000e+00> : vector<128x128xf32>
      %29 = tpu.matmul %25, %28, %cst_19 {dimension_numbers = #tpu.dot_dimension_numbers<[1], [0], [0], [1], [0, 0, 1, 1], [], []>} : vector<128x128xbf16>, vector<128x128xbf16>, vector<128x128xf32> -> vector<128x128xf32>
      %30 = arith.index_cast %1 : i32 to index
      %c0_20 = arith.constant 0 : index
      %31 = vector.load %arg11[%30, %c0_20] : memref<256x128xf32, #tpu.memory_space<vmem>>, vector<128x128xf32>
      tpu.vector_store %arg11[%30, %c0_20], %27 {strides = array<i32>} : memref<256x128xf32, #tpu.memory_space<vmem>>, vector<128x128xf32>,
      %32 = arith.index_cast %1 : i32 to index
      %c0_21 = arith.constant 0 : index
      %33 = vector.load %arg12[%32, %c0_21] : memref<256x128xf32, #tpu.memory_space<vmem>>, vector<128x128xf32>
      tpu.vector_store %arg12[%32, %c0_21], %29 {strides = array<i32>} : memref<256x128xf32, #tpu.memory_space<vmem>>, vector<128x128xf32>,
      %c0_22 = arith.constant 0 : index
      %c0_23 = arith.constant 0 : index
      %34 = vector.load %arg10[%c0_22, %c0_23] : memref<128x128xf32, #tpu.memory_space<vmem>>, vector<128x128xf32>
      tpu.vector_store %arg10[%c0_22, %c0_23], %27 {strides = array<i32>} : memref<128x128xf32, #tpu.memory_space<vmem>>, vector<128x128xf32>,
    } else {
    }
    %c1_i32 = arith.constant 1 : i32
    %7 = arith.cmpi eq, %arg0, %c1_i32 : i32
    %8 = arith.extui %7 : i1 to i32
    %c0_i32_1 = arith.constant 0 : i32
    %9 = arith.cmpi ne, %8, %c0_i32_1 : i32
    scf.if %9 {
      %10 = arith.index_cast %1 : i32 to index
      %c0_2 = arith.constant 0 : index
      %11 = vector.load %arg11[%10, %c0_2] : memref<256x128xf32, #tpu.memory_space<vmem>>, vector<128x128xf32>
      %c0_3 = arith.constant 0 : index
      %c0_4 = arith.constant 0 : index
      %12 = vector.load %arg12[%c0_3, %c0_4] : memref<256x128xf32, #tpu.memory_space<vmem>>, vector<256x128xf32>
      %13 = arith.truncf %12 : vector<256x128xf32> to vector<256x128xbf16>
      %cst = arith.constant dense<0.000000e+00> : vector<128x128xf32>
      %14 = tpu.matmul %3, %13, %cst {dimension_numbers = #tpu.dot_dimension_numbers<[1], [0], [0], [1], [0, 0, 1, 1], [], []>} : vector<128x256xbf16>, vector<256x128xbf16>, vector<128x128xf32> -> vector<128x128xf32>
      %15 = arith.addf %11, %14 : vector<128x128xf32>
      %c0_5 = arith.constant 0 : index
      %c0_6 = arith.constant 0 : index
      %16 = vector.load %arg9[%c0_5, %c0_6] : memref<1x128xf32, #tpu.memory_space<vmem>>, vector<1x128xf32>
      %17 = vector.broadcast %16 : vector<1x128xf32> to vector<128x128xf32>
      %18 = arith.addf %15, %17 : vector<128x128xf32>
      %19 = tpu.iota {dimensions = array<i32: 1>} : vector<128x128xi32>
      %c8_i32 = arith.constant 8 : i32
      %20 = vector.broadcast %c8_i32 : i32 to vector<128x128xi32>
      %21 = arith.cmpi slt, %19, %20 : vector<128x128xi32>
      %cst_7 = arith.constant -1.000000e+30 : f32
      %22 = vector.broadcast %cst_7 : f32 to vector<128x128xf32>
      %23 = arith.select %21, %18, %22 : vector<128x128xi1>, vector<128x128xf32>
      %cst_8 = arith.constant dense<0xFF800000> : vector<128xf32>
      %24 = vector.multi_reduction <maximumf>, %23, %cst_8 [1] : vector<128x128xf32> to vector<128xf32>
      %25 = vector.shape_cast %24 : vector<128xf32> to vector<128x1xf32>
      %26 = vector.broadcast %25 : vector<128x1xf32> to vector<128x128xf32>
      %27 = arith.subf %23, %26 : vector<128x128xf32>
      %28 = math.exp %27 : vector<128x128xf32>
      %cst_9 = arith.constant dense<0.000000e+00> : vector<128xf32>
      %29 = vector.multi_reduction <add>, %28, %cst_9 [1] : vector<128x128xf32> to vector<128xf32>
      %30 = vector.shape_cast %29 : vector<128xf32> to vector<128x1xf32>
      %31 = math.log %30 : vector<128x1xf32>
      %32 = vector.broadcast %31 : vector<128x1xf32> to vector<128x128xf32>
      %33 = arith.subf %27, %32 : vector<128x128xf32>
      %c0_10 = arith.constant 0 : index
      %c0_11 = arith.constant 0 : index
      %34 = vector.load %arg10[%c0_10, %c0_11] : memref<128x128xf32, #tpu.memory_space<vmem>>, vector<128x128xf32>
      tpu.vector_store %arg10[%c0_10, %c0_11], %33 {strides = array<i32>} : memref<128x128xf32, #tpu.memory_space<vmem>>, vector<128x128xf32>,
    } else {
    }
    return
  }
  func.func @transform_0(%arg0: i32, %arg1: i32) -> (i32, i32) {
    %c0_i32 = arith.constant 0 : i32
    %c0_i32_0 = arith.constant 0 : i32
    %c0_i32_1 = arith.constant 0 : i32
    return %c0_i32, %c0_i32_0 : i32, i32
  }
  func.func @transform_1(%arg0: i32, %arg1: i32) -> (i32, i32) {
    %c0_i32 = arith.constant 0 : i32
    %c0_i32_0 = arith.constant 0 : i32
    %c0_i32_1 = arith.constant 0 : i32
    return %c0_i32, %c0_i32_0 : i32, i32
  }
  func.func @transform_2(%arg0: i32, %arg1: i32) -> (i32, i32) {
    %c0_i32 = arith.constant 0 : i32
    %c0_i32_0 = arith.constant 0 : i32
    %c0_i32_1 = arith.constant 0 : i32
    return %c0_i32, %c0_i32_0 : i32, i32
  }
  func.func @transform_3(%arg0: i32, %arg1: i32) -> (i32, i32) {
    %c0_i32 = arith.constant 0 : i32
    %c0_i32_0 = arith.constant 0 : i32
    %c0_i32_1 = arith.constant 0 : i32
    return %c0_i32, %c0_i32_0 : i32, i32
  }
  func.func @transform_4(%arg0: i32, %arg1: i32) -> (i32, i32) {
    %c0_i32 = arith.constant 0 : i32
    %c0_i32_0 = arith.constant 0 : i32
    %c0_i32_1 = arith.constant 0 : i32
    return %c0_i32, %c0_i32_0 : i32, i32
  }
  func.func @transform_5(%arg0: i32, %arg1: i32) -> (i32, i32) {
    %c0_i32 = arith.constant 0 : i32
    %c0_i32_0 = arith.constant 0 : i32
    %c0_i32_1 = arith.constant 0 : i32
    return %c0_i32, %c0_i32_0 : i32, i32
  }
  func.func @transform_6(%arg0: i32, %arg1: i32) -> (i32, i32) {
    %c0_i32 = arith.constant 0 : i32
    %c0_i32_0 = arith.constant 0 : i32
    %c0_i32_1 = arith.constant 0 : i32
    return %c0_i32, %c0_i32_0 : i32, i32
  }
  func.func @transform_7(%arg0: i32, %arg1: i32) -> (i32, i32) {
    %c0_i32 = arith.constant 0 : i32
    %c0_i32_0 = arith.constant 0 : i32
    %c0_i32_1 = arith.constant 0 : i32
    return %c0_i32, %c0_i32_0 : i32, i32
  }
  func.func @transform_8(%arg0: i32, %arg1: i32) -> (i32, i32) {
    %c0_i32 = arith.constant 0 : i32
    %c0_i32_0 = arith.constant 0 : i32
    return %arg1, %c0_i32 : i32, i32
  }
}

</mosaic_0001>

<bundles_post_ra>
// kernel: tpu_custom_call.1
= control target key start
LH: loop header
LB: loop body
LE: loop exit
PB: predicated region body
PF: predicated region fallthrough
CT: control target
= control target key end

     0   :  { %s3841_s0 = inlined_call_operand.hbm [shape: bf16[256,256], index: 0, kind: input, shape index: {}]   ;;  %s3842_s1 = inlined_call_operand.hbm [shape: bf16[256,128], index: 1, kind: input, shape index: {}]   ;;  %s3843_s2 = inlined_call_operand.hbm [shape: bf16[128,128], index: 2, kind: input, shape index: {}]   ;;  %s3844_s3 = inlined_call_operand.hbm [shape: bf16[128,128], index: 3, kind: input, shape index: {}]   ;;  %s3845_s4 = inlined_call_operand.vmem [shape: f32[1,128], index: 4, kind: input, shape index: {}]   ;;  %s3846_s5 = inlined_call_operand.hbm [shape: bf16[128,128], index: 5, kind: input, shape index: {}]   ;;  %s3847_s6 = inlined_call_operand.hbm [shape: bf16[128,128], index: 6, kind: input, shape index: {}]   ;;  %s3848_s7 = inlined_call_operand.vmem [shape: f32[1,128], index: 7, kind: input, shape index: {}]   ;;  %s3849_s8 = inlined_call_operand.hbm [shape: f32[256,128], index: 8, kind: output, shape index: {}]  }
   0x1   :  { %3858 = sst [smem:[#allocation25_spill]] %s3842_s1 }
   0x2   :  { %3859 = sst [smem:[#allocation26_spill]] %s3844_s3 }
   0x3   :  { %13 = vsyncpa [#allocation5], 0 }
   0x4   :  { %14 = vsyncpa [#allocation8], 0 }
   0x5   :  { %15 = vsyncpa [#allocation11], 0 }
   0x6   :  { %16 = vsyncpa [#allocation14], 0 }
   0x7   :  { %17 = vsyncpa [#allocation6], 0 }
   0x8   :  { %19 = vsyncpa [#allocation6 + $0x1], 0  ;;  %s3195_s27 = smov 0   ;;  %s3197_s28 = smov 0  }
   0x9   :  { %s3199_s29 = smov 0   ;;  %s3201_s30 = smov 0  }
   0xa   :  { %s3203_s9 = smov 0   ;;  %s3205_s10 = smov 0  }
   0xb   :  { %s3207_s11 = smov 0   ;;  %s3209_s12 = smov 0  }
   0xc LB: > { %3860 = sst [smem:[#allocation21_spill]] %s3127_s10  ;;  %s2157_s13 = sadd.s32 4294967295, %s3135_s12   ;;  %s3135_s12 = sphi %s3209_s12, %s25_s12   ;;  %s3131_s11 = sphi %s3207_s11, %s3879_s11   ;;  %s3127_s10 = sphi %s3205_s10, %s3878_s10   ;;  %s3123_s9 = sphi %s3203_s9, %s3877_s9   ;;  %s3119_s30 = sphi %s3201_s30, %s3876_s30   ;;  %s3115_s29 = sphi %s3199_s29, %s3882_s29   ;;  %s3111_s28 = sphi %s3197_s28, %s3881_s28   ;;  %s3107_s27 = sphi %s3195_s27, %s3880_s27  }
   0xd   : > { %3861 = sst [smem:[#allocation22_spill]] %s3131_s11  ;;  %s2158_s14 = sadd.s32 4294967294, %s3135_s12  }
   0xe   : > { %s34_s15 = sadd.s32 1, %s3127_s10  ;;  %s37_s16 = sadd.s32 1, %s3131_s11 }
   0xf   : > { %p35_p0 = scmp.ge.s32.totalorder %s34_s15, 2  ;;  %s212_s17 = sadd.s32 1, %s3115_s29 }
  0x10   : > { %p222_p1 = scmp.ne.s32.totalorder %s3115_s29, %s3111_s28  ;;  %p223_p2 = scmp.eq.s32.totalorder %s2157_s13, 3 }
  0x11   : > { %s3884_s15 = smov (%p35_p0, %s34_s15), 0  ;;  %s3886_s16 = smov (!%p35_p0, %s37_s16), %s3131_s11 }
  0x12   : > { %3862 = sst [smem:[#allocation23_spill]] %s3884_s15  ;;  %s209_s18 = ssub.s32 %s3127_s10, %s3884_s15 }
  0x13   : > { %p3247_p3 = por %p223_p2, %p222_p1  ;;  %p39_p4 = scmp.ge.s32.totalorder %s3886_s16, 2 }
  0x14   : > { %p210_p5 = scmp.eq.s32.totalorder %s209_s18, 0  ;;  %p228_p6 = scmp.ne.s32.totalorder %s3111_s28, %s3107_s27 }
  0x15   : > { %s3863_s19 = scalar_select %p3247_p3, 1, 0 }
  0x16   : > { %p229_p7 = scmp.eq.s32.totalorder %s2158_s14, 3  ;;  %s3888_s16 = smov (%p39_p4, %s3886_s16), 0 }
  0x17   : > { %3864 = sst [smem:[#allocation24_spill]] %s3888_s16  ;;  %p2159_p9 = scmp.ge.s32.totalorder %s3135_s12, 1 }
  0x18   : > { %s3256_s20 = scalar_select %p210_p5, %s3115_s29, %s212_s17  }
  0x19   : > { %p3258_p8 = por %p229_p7, %p228_p6  ;;  %p236_p10 = scmp.lt.s32.totalorder %s3135_s12, 5 }
  0x1a   : > { %p3264_p11 = scmp.eq.s32.totalorder %s2157_s13, 0  ;;  %s3137_s24 = smov [#allocation7]  }
  0x1b   : > { %s3865_s21 = scalar_select %p3258_p8, 1, 0 }
  0x1c   : > { %p3268_p12 = pnand %p2159_p9, %p236_p10  ;;  %s261_s25 = sshll.u32 %s3137_s24, 4  ;;  %s262_s25 = int_to_ptr.vmem [resolvable:$true] %s261_s25 }
  0x1d   : > { %s3138_s13 = smov [#allocation10]   ;;  %s2882_s18 = scalar_lea.vmem %s262_s25, 2048 }
  0x1e   : > { %p2639_p13 = pneg %p3268_p12  ;;  %s287_s14 = sshll.u32 %s3138_s13, 4  ;;  %s288_s14 = int_to_ptr.vmem [resolvable:$true] %s287_s14 }
  0x1f   : > { %p2883_p2 = scmp.ne.s32.totalorder %s262_s25, %s2882_s18  ;;  %p2890_p6 = scmp.lt.s32.totalorder %s262_s25, %s262_s25 }
  0x20   : > { %p3276_p0 = pnand %p3264_p11, %p2639_p13  ;;  %p2891_p7 = scmp.lt.s32.totalorder %s2882_s18, %s2882_s18 }
  0x22   : > { %p3282_p1 = pneg %p3276_p0  ;;  %p2892_p9 = por %p2891_p7, %p2890_p6 }
  0x24   : > { %p2885_p4 = pnand %p2883_p2, %p3282_p1 }
  0x26   : > { %p2886_p5 = pneg %p2885_p4 }
  0x28   : > { %p2893_p10 = pnand %p2892_p9, %p2886_p5 }
  0x2a   : > { %2896 = shalt.err (!%p2893_p10)
}
  0x2b   : > { %s3853_s24 = smov 64   ;;  %s3855_s13 = smov 4  }
  0x2c   : > { %s3870_s1 = sld [smem:[#allocation25_spill]]  ;;  %s2908_s11 = scalar_lea.vmem %s288_s14, 1024 }
  0x2d   : > { %p2909_p13 = scmp.ne.s32.totalorder %s288_s14, %s2908_s11  ;;  %p2916_p6 = scmp.lt.s32.totalorder %s288_s14, %s288_s14 }
  0x2e   : > { %p2917_p5 = scmp.lt.s32.totalorder %s2908_s11, %s2908_s11 }
  0x2f   : > { %p2911_p2 = pnand %p2909_p13, %p3282_p1 }
  0x30   : > { %p2918_p7 = por %p2917_p5, %p2916_p6 }
  0x31   : > { %p2912_p4 = pneg %p2911_p2 }
  0x32   : > { %2645 = dma.hbm_to_vmem [thread:$0]  (!%p3276_p0), %s3870_s1, 2048, %s262_s25, [#allocation8], %s3853_s24, %s3853_s24, %s3855_s13  }
  0x33   : > { %p2919_p9 = pnand %p2918_p7, %p2912_p4 }
  0x35   : > { %2922 = shalt.err (!%p2919_p9)
}
  0x36   : > { %s3871_s3 = sld [smem:[#allocation26_spill]]  ;;  %s3141_s15 = smov [#allocation4]  }
  0x37   : > { %s248_s16 = sshll.u32 %s3141_s15, 4  ;;  %s249_s16 = int_to_ptr.vmem [resolvable:$true] %s248_s16 }
  0x38   : > { %s2934_s25 = scalar_lea.vmem %s249_s16, 4096  ;;  %p2942_p4 = scmp.lt.s32.totalorder %s249_s16, %s249_s16 }
  0x39   : > { %p2935_p10 = scmp.ne.s32.totalorder %s249_s16, %s2934_s25  ;;  %p2943_p6 = scmp.lt.s32.totalorder %s2934_s25, %s2934_s25 }
  0x3b   : > { %p2937_p13 = pnand %p2935_p10, %p3282_p1  ;;  %p2944_p5 = por %p2943_p6, %p2942_p4 }
  0x3c   : > { %2651 = dma.hbm_to_vmem [thread:$0]  (!%p3276_p0), %s3871_s3, 1024, %s288_s14, [#allocation11], %s3853_s24, %s3853_s24, %s3855_s13  }
  0x3d   : > { %p2938_p2 = pneg %p2937_p13 }
  0x3f   : > { %p2945_p7 = pnand %p2944_p5, %p2938_p2 }
  0x41   : > { %2948 = shalt.err (!%p2945_p7)
}
  0x42   : > { %s3142_s11 = smov 128   ;;  %s3143_s1 = smov 8  }
  0x43   : > { %2642 = dma.hbm_to_vmem [thread:$0]  (!%p3276_p0), %s3841_s0, 4096, %s249_s16, [#allocation5], %s3142_s11, %s3142_s11, %s3143_s1  }
  0x44   : > { %s3144_s18 = smov [#allocation9]   ;;  %s3145_s24 = smov [#allocation12]  }
  0x45   : > { %s274_s15 = sshll.u32 %s3144_s18, 4  ;;  %s303_s13 = sshll.u32 %s3145_s24, 4  ;;  %s275_s15 = int_to_ptr.vmem [resolvable:$true] %s274_s15  ;;  %s304_s13 = int_to_ptr.vmem [resolvable:$true] %s303_s13 }
  0x46   : > { %s2960_s3 = scalar_lea.vmem %s275_s15, 1024  ;;  %p2968_p2 = scmp.lt.s32.totalorder %s275_s15, %s275_s15 }
  0x47   : > { %p2961_p9 = scmp.ne.s32.totalorder %s275_s15, %s2960_s3  ;;  %p2969_p4 = scmp.lt.s32.totalorder %s2960_s3, %s2960_s3 }
  0x49   : > { %p2963_p10 = pnand %p2961_p9, %p3282_p1  ;;  %p2970_p6 = por %p2969_p4, %p2968_p2 }
  0x4b   : > { %p2964_p13 = pneg %p2963_p10 }
  0x4d   : > { %p2971_p5 = pnand %p2970_p6, %p2964_p13 }
  0x4f   : > { %2974 = shalt.err (!%p2971_p5)
}
  0x50   : > { %s3872_s25 = smov 4   ;;  %s3873_s1 = smov 64  }
  0x51   : > { %2648 = dma.hbm_to_vmem [thread:$0]  (!%p3276_p0), %s3843_s2, 1024, %s275_s15, [#allocation8], %s3873_s1, %s3873_s1, %s3872_s25  }
  0x52   : > { %s2986_s24 = scalar_lea.vmem %s304_s13, 1024  ;;  %p2994_p8 = scmp.lt.s32.totalorder %s304_s13, %s304_s13 }
  0x53   : > { %p2987_p7 = scmp.ne.s32.totalorder %s304_s13, %s2986_s24  ;;  %p2995_p3 = scmp.lt.s32.totalorder %s2986_s24, %s2986_s24 }
  0x55   : > { %p2989_p9 = pnand %p2987_p7, %p3282_p1  ;;  %p2996_p2 = por %p2995_p3, %p2994_p8 }
  0x57   : > { %p2990_p10 = pneg %p2989_p9 }
  0x59   : > { %p2997_p13 = pnand %p2996_p2, %p2990_p10 }
  0x5b   : > { %3000 = shalt.err (!%p2997_p13)
}
  0x5c   : > { %2654 = dma.hbm_to_vmem [thread:$0]  (!%p3276_p0), %s3846_s5, 1024, %s304_s13, [#allocation11], %s3873_s1, %s3873_s1, %s3872_s25  }
  0x5d   : > { %s3146_s14 = smov [#allocation13]  }
  0x5e   : > { %s316_s18 = sshll.u32 %s3146_s14, 4  ;;  %s317_s18 = int_to_ptr.vmem [resolvable:$true] %s316_s18 }
  0x5f   : > { %s3012_s15 = scalar_lea.vmem %s317_s18, 1024  ;;  %p3020_p8 = scmp.lt.s32.totalorder %s317_s18, %s317_s18 }
  0x60   : > { %p3013_p4 = scmp.ne.s32.totalorder %s317_s18, %s3012_s15  ;;  %p3021_p5 = scmp.lt.s32.totalorder %s3012_s15, %s3012_s15 }
  0x62   : > { %p3015_p6 = pnand %p3013_p4, %p3282_p1  ;;  %p3022_p7 = por %p3021_p5, %p3020_p8 }
  0x64   : > { %p3016_p3 = pneg %p3015_p6 }
  0x66   : > { %p3023_p9 = pnand %p3022_p7, %p3016_p3 }
  0x68   : > { %3026 = shalt.err (!%p3023_p9)
}
  0x69   : > { %2657 = dma.hbm_to_vmem [thread:$0]  (!%p3276_p0), %s3847_s6, 1024, %s317_s18, [#allocation14], %s3873_s1, %s3873_s1, %s3872_s25  }
  0x6a   : > { %335 = sbr.rel (%p3268_p12) target bundleno = 1480 (0x5c8), region = 52 }
  0x6f   : > { %3086 = dma.done.wait (%p3264_p11), [#allocation5], 4096  }
  0x70   : > { %3088 = vsyncadd (%p3264_p11), [#allocation5], 4294963200 }
  0x71   : > { %3090 = dma.done.wait (%p3264_p11), [#allocation8], 3072  }
  0x72   : > { %3092 = vsyncadd (%p3264_p11), [#allocation8], 4294964224 }
  0x73   : > { %3094 = dma.done.wait (%p3264_p11), [#allocation11], 2048  }
  0x74   : > { %3096 = vsyncadd (%p3264_p11), [#allocation11], 4294965248 }
  0x75   : > { %3098 = dma.done.wait (%p3264_p11), [#allocation14], 1024  }
  0x76   : > { %3100 = vsyncadd (%p3264_p11), [#allocation14], 4294966272  ;;  %s3362_s23 = sshll.u32 %s3119_s30, 7  ;;  %s381_s26 = sand.u32 1, %s3111_s28  }
  0x77   : > { %s387_s17 = sshra.s32 %s3362_s23, 3  ;;  %s2173_s25 = sshll.u32 %s381_s26, 7 }
  0x78   : > { %s391_s1 = scalar_lea.vmem [#allocation4], %s3362_s23  ;;  %s3401_s22 = scalar_lea.vmem [#allocation15], %s2173_s25 }
  0x79   : > { %v3369_v0 = vld [vmem:[%s391_s1] sm:$0xff]  ;;  %v3371_v1 = vld [vmem:[%s391_s1 + $0x8] sm:$0xff]  ;;  %v3373_v2 = vld [vmem:[%s391_s1 + $0x10] sm:$0xff]  ;;  %p2177_p11 = scmp.ne.s32.totalorder %s3123_s9, 0 }
  0x7a   : > { %v3375_v3 = vld [vmem:[%s391_s1 + $0x18] sm:$0xff]  ;;  %v3377_v4 = vld [vmem:[%s391_s1 + $0x20] sm:$0xff]  ;;  %v3379_v5 = vld [vmem:[%s391_s1 + $0x28] sm:$0xff]  ;;  %s2210_s11 = sshll.u32 (!%p2177_p11), %s387_s17, 2  ;;  %s3482_s14 = scalar_lea.vmem (!%p2177_p11), [#allocation2], %s3362_s23 }
  0x7b   : > { %v3381_v6 = vld [vmem:[%s391_s1 + $0x30] sm:$0xff]  ;;  %v3383_v7 = vld [vmem:[%s391_s1 + $0x38] sm:$0xff]  ;;  %v3385_v8 = vld [vmem:[%s391_s1 + $0x40] sm:$0xff]  ;;  %411 = sbr.rel (%p2177_p11) target bundleno = 861 (0x35d), region = 80  ;;  %s3438_s24 = scalar_lea.vmem (!%p2177_p11), [#allocation7], %s2210_s11 }
  0x7c   : > { %v3387_v9 = vld [vmem:[%s391_s1 + $0x48] sm:$0xff]  ;;  %v3389_v10 = vld [vmem:[%s391_s1 + $0x50] sm:$0xff]  ;;  %v3391_v11 = vld [vmem:[%s391_s1 + $0x58] sm:$0xff]  ;;  %s3487_s18 = scalar_lea.vmem (!%p2177_p11), [#allocation3], %s3362_s23 }
  0x7d   : > { %v3393_v12 = vld [vmem:[%s391_s1 + $0x60] sm:$0xff]  ;;  %v3395_v13 = vld [vmem:[%s391_s1 + $0x68] sm:$0xff]  ;;  %v3397_v14 = vld [vmem:[%s391_s1 + $0x70] sm:$0xff] }
  0x7e   : > { %v3399_v15 = vld [vmem:[%s391_s1 + $0x78] sm:$0xff] }
  0x80   : > { %v2751_v16 = vld [vmem:[#allocation7 + $0x78] sm:$0xff]   ;;  %v2179_v17 = vcombine.high %v3369_v0, %v3371_v1  ;;  %v2753_v19 = vld [vmem:[#allocation7 + $0x70] sm:$0xff]   ;;  %v2755_v21 = vld [vmem:[#allocation7 + $0x68] sm:$0xff]   ;;  %v2178_v37 = vcombine.low %v3369_v0, %v3371_v1  ;;  %v2181_v38 = vcombine.high %v3373_v2, %v3375_v3  ;;  %v2180_v39 = vcombine.low %v3373_v2, %v3375_v3 }
  0x81   : > { %v2752_v18 = vld [vmem:[#allocation7 + $0x38] sm:$0xff]   ;;  %2277 = vmatprep.subr.bf16.mxu0 %v2751_v16  ;;  %v2754_v20 = vld [vmem:[#allocation7 + $0x30] sm:$0xff]   ;;  %v2756_v22 = vld [vmem:[#allocation7 + $0x28] sm:$0xff]   ;;  %v2183_v40 = vcombine.high %v3377_v4, %v3379_v5  ;;  %v2182_v41 = vcombine.low %v3377_v4, %v3379_v5  ;;  %v2185_v42 = vcombine.high %v3381_v6, %v3383_v7  ;;  %v2184_v43 = vcombine.low %v3381_v6, %v3383_v7 }
  0x82   : > { %652 = vmatprep.mubr.bf16.mxu0 %v2179_v17  ;;  %2278 = vmatpush3.bf16.msra.mxu0 %v2752_v18  ;;  %v2757_v23 = vld [vmem:[#allocation7 + $0x60] sm:$0xff]   ;;  %v2759_v25 = vld [vmem:[#allocation7 + $0x58] sm:$0xff]   ;;  %v2761_v27 = vld [vmem:[#allocation7 + $0x50] sm:$0xff]   ;;  %v2187_v44 = vcombine.high %v3385_v8, %v3387_v9  ;;  %v2186_v45 = vcombine.low %v3385_v8, %v3387_v9  ;;  %v2189_v46 = vcombine.high %v3389_v10, %v3391_v11 }
  0x83   : > { %2279 = vmatprep.subr.bf16.mxu0 %v2753_v19  ;;  %v2758_v24 = vld [vmem:[#allocation7 + $0x20] sm:$0xff]   ;;  %v2760_v26 = vld [vmem:[#allocation7 + $0x18] sm:$0xff]   ;;  %v2762_v29 = vld [vmem:[#allocation7 + $0x10] sm:$0xff]   ;;  %v2188_v47 = vcombine.low %v3389_v10, %v3391_v11  ;;  %v2191_v48 = vcombine.high %v3393_v12, %v3395_v13  ;;  %v2190_v49 = vcombine.low %v3393_v12, %v3395_v13  ;;  %v2193_v50 = vcombine.high %v3397_v14, %v3399_v15 }
  0x84   : > { %v2767_v28 = vld [vmem:[#allocation10 + $0x38] sm:$0xff]   ;;  %v2768_v30 = vld [vmem:[#allocation10 + $0x30] sm:$0xff]   ;;  %v2763_v31 = vld [vmem:[#allocation7 + $0x48] sm:$0xff]   ;;  %v2192_v51 = vcombine.low %v3397_v14, %v3399_v15 }
  0x85   : > { %2469 = vmatprep.subr.bf16.mxu1 %v2767_v28  ;;  %v2769_v32 = vld [vmem:[#allocation10 + $0x28] sm:$0xff]   ;;  %v2765_v34 = vld [vmem:[#allocation7 + $0x40] sm:$0xff]   ;;  %v2771_v52 = vld [vmem:[#allocation10 + $0x18] sm:$0xff]  }
  0x86   : > { %2280 = vmatpush3.bf16.msra.mxu0 %v2754_v20  ;;  %2470 = vmatpush3.bf16.msra.mxu1 %v2767_v28  ;;  %v2764_v33 = vld [vmem:[#allocation7 + $0x8] sm:$0xff]   ;;  %v2770_v35 = vld [vmem:[#allocation10 + $0x20] sm:$0xff]   ;;  %v2772_v53 = vld [vmem:[#allocation10 + $0x10] sm:$0xff]  }
  0x87   : > { %2281 = vmatprep.subr.bf16.mxu0 %v2755_v21  ;;  %2471 = vmatprep.subr.bf16.mxu1 %v2768_v30  ;;  %v2766_v36 = vld [vmem:[#allocation7] sm:$0xff]   ;;  %v2773_v54 = vld [vmem:[#allocation10 + $0x8] sm:$0xff]   ;;  %v2775_v56 = vld [vmem:[#allocation9 + $0x38] sm:$0xff]  }
  0x88   : > { %v2774_v55 = vld [vmem:[#allocation10] sm:$0xff]  }
  0x8a   : > { %2282 = vmatpush3.bf16.msra.mxu0 %v2756_v22  ;;  %2472 = vmatpush3.bf16.msra.mxu1 %v2768_v30 }
  0x8b   : > { %2283 = vmatprep.subr.bf16.mxu0 %v2757_v23  ;;  %2473 = vmatprep.subr.bf16.mxu1 %v2769_v32 }
  0x8e   : > { %2284 = vmatpush3.bf16.msra.mxu0 %v2758_v24  ;;  %2474 = vmatpush3.bf16.msra.mxu1 %v2769_v32  ;;  %v2776_v24 = vld [vmem:[#allocation9 + $0x30] sm:$0xff]  }
  0x8f   : > { %2285 = vmatprep.subr.bf16.mxu0 %v2759_v25  ;;  %2475 = vmatprep.subr.bf16.mxu1 %v2770_v35 }
  0x92   : > { %2286 = vmatpush3.bf16.msra.mxu0 %v2760_v26  ;;  %2476 = vmatpush3.bf16.msra.mxu1 %v2770_v35 }
  0x93   : > { %2287 = vmatprep.subr.bf16.mxu0 %v2761_v27  ;;  %2477 = vmatprep.subr.bf16.mxu1 %v2771_v52  ;;  %v2777_v27 = vld [vmem:[#allocation9 + $0x28] sm:$0xff]  }
  0x96   : > { %2288 = vmatpush3.bf16.msra.mxu0 %v2762_v29  ;;  %2478 = vmatpush3.bf16.msra.mxu1 %v2771_v52 }
  0x97   : > { %2289 = vmatprep.subr.bf16.mxu0 %v2763_v31  ;;  %2479 = vmatprep.subr.bf16.mxu1 %v2772_v53 }
  0x9a   : > { %2290 = vmatpush3.bf16.msra.mxu0 %v2764_v33  ;;  %2480 = vmatpush3.bf16.msra.mxu1 %v2772_v53  ;;  %v2778_v33 = vld [vmem:[#allocation9 + $0x20] sm:$0xff]  }
  0x9b   : > { %2291 = vmatprep.subr.bf16.mxu0 %v2765_v34  ;;  %2481 = vmatprep.subr.bf16.mxu1 %v2773_v54 }
  0x9e   : > { %2292 = vmatpush3.bf16.msra.mxu0 %v2766_v36  ;;  %2482 = vmatpush3.bf16.msra.mxu1 %v2773_v54  ;;  %v2779_v36 = vld [vmem:[#allocation9 + $0x18] sm:$0xff]  }
  0x9f   : > { %2483 = vmatprep.subr.bf16.mxu1 %v2774_v55 }
  0xa1   : > { %653 = vmatmul.mubr.bf16.vlgmr.msra.gmra.mxu0 %v2178_v37 }
  0xa2   : > { %660 = vmatprep.mubr.bf16.mxu0 %v2181_v38  ;;  %2484 = vmatpush3.bf16.msra.mxu1 %v2774_v55 }
  0xa3   : > { %2501 = vmatprep.subr.bf16.mxu1 %v2775_v56 }
  0xa9   : > { %661 = vmatmul.mubr.bf16.gmra.mxu0 %v2180_v39 }
  0xaa   : > { %668 = vmatprep.mubr.bf16.mxu0 %v2183_v40 }
  0xb1   : > { %669 = vmatmul.mubr.bf16.gmra.mxu0 %v2182_v41 }
  0xb2   : > { %676 = vmatprep.mubr.bf16.mxu0 %v2185_v42  ;;  %v2780_v42 = vld [vmem:[#allocation9 + $0x10] sm:$0xff]  }
  0xb9   : > { %677 = vmatmul.mubr.bf16.gmra.mxu0 %v2184_v43 }
  0xba   : > { %684 = vmatprep.mubr.bf16.mxu0 %v2187_v44 }
  0xc1   : > { %685 = vmatmul.mubr.bf16.gmra.mxu0 %v2186_v45  ;;  %v2781_v45 = vld [vmem:[#allocation9 + $0x8] sm:$0xff]  }
  0xc2   : > { %692 = vmatprep.mubr.bf16.mxu0 %v2189_v46 }
  0xc9   : > { %693 = vmatmul.mubr.bf16.gmra.mxu0 %v2188_v47 }
  0xca   : > { %700 = vmatprep.mubr.bf16.mxu0 %v2191_v48 }
  0xd1   : > { %701 = vmatmul.mubr.bf16.gmra.mxu0 %v2190_v49 }
  0xd2   : > { %708 = vmatprep.mubr.bf16.mxu0 %v2193_v50 }
  0xd9   : > { %709 = vmatmul.mubr.bf16.gmra.mxu0 %v2192_v51  ;;  %v2782_v51 = vld [vmem:[#allocation9] sm:$0xff]  }
 0x161   : > { %v2293_v57 = vpop.f32.mrf.mxu0 }
 0x163   : > { %v2294_v58 = vpop.f32.mrf.mxu0 }
 0x164   : > { %v2295_v61 = vadd.f32 %v2294_v58, %v2293_v57 }
 0x165   : > { %v2296_v59 = vpop.f32.mrf.mxu0 }
 0x167   : > { %v2297_v60 = vpop.f32.mrf.mxu0 }
 0x168   : > { %v2298_v62 = vadd.f32 %v2297_v60, %v2296_v59 }
 0x169   : > { %v2299_v63 = vpop.f32.mrf.mxu0 }
 0x16a   : > { %v751_v16 = vpack.c.bf16 %v2298_v62, %v2295_v61 }
 0x16b   : > { %v2300_v17 = vpop.f32.mrf.mxu0 }
 0x16c   : > { %2485 = vmatprep.mubr.bf16.mxu1 %v751_v16  ;;  %v2301_v20 = vadd.f32 %v2300_v17, %v2299_v63 }
 0x16d   : > { %v2302_v18 = vpop.f32.mrf.mxu0 }
 0x16f   : > { %v2303_v19 = vpop.f32.mrf.mxu0 }
 0x170   : > { %v2304_v21 = vadd.f32 %v2303_v19, %v2302_v18 }
 0x171   : > { %v2305_v22 = vpop.f32.mrf.mxu0 }
 0x172   : > { %v752_v23 = vpack.c.bf16 %v2304_v21, %v2301_v20 }
 0x173   : > { %v2306_v25 = vpop.f32.mrf.mxu0 }
 0x174   : > { %2486 = vmatmul.mubr.bf16.vlgmr.msra.gmra.mxu1 %v752_v23  ;;  %v2307_v29 = vadd.f32 %v2306_v25, %v2305_v22  ;;  %v2783_v23 = vld [vmem:[%s3438_s24] sm:$0xff]   ;;  %v2784_v25 = vld [vmem:[%s3438_s24 + $0x8] sm:$0xff]  }
 0x175   : > { %v2308_v26 = vpop.f32.mrf.mxu0  ;;  %2502 = vmatpush3.bf16.msra.mxu1 %v2775_v56 }
 0x176   : > { %2503 = vmatprep.subr.bf16.mxu1 %v2776_v24 }
 0x177   : > { %v2309_v28 = vpop.f32.mrf.mxu0 }
 0x178   : > { %v2310_v30 = vadd.f32 %v2309_v28, %v2308_v26  ;;  %v2785_v26 = vld [vmem:[%s3438_s24 + $0x10] sm:$0xff]   ;;  %v2787_v28 = vld [vmem:[%s3438_s24 + $0x20] sm:$0xff]  }
 0x179   : > { %v2311_v31 = vpop.f32.mrf.mxu0  ;;  %2504 = vmatpush3.bf16.msra.mxu1 %v2776_v24 }
 0x17a   : > { %v753_v32 = vpack.c.bf16 %v2310_v30, %v2307_v29  ;;  %2505 = vmatprep.subr.bf16.mxu1 %v2777_v27  ;;  %v2788_v29 = vld [vmem:[%s3438_s24 + $0x28] sm:$0xff]   ;;  %v2789_v30 = vld [vmem:[%s3438_s24 + $0x30] sm:$0xff]  }
 0x17b   : > { %v2312_v34 = vpop.f32.mrf.mxu0 }
 0x17c   : > { %2489 = vmatprep.mubr.bf16.mxu1 %v753_v32  ;;  %v2313_v38 = vadd.f32 %v2312_v34, %v2311_v31  ;;  %v2791_v31 = vld [vmem:[#allocation12 + $0x38] sm:$0xff]   ;;  %v2792_v32 = vld [vmem:[#allocation12 + $0x30] sm:$0xff]   ;;  %v2793_v34 = vld [vmem:[#allocation12 + $0x28] sm:$0xff]  }
 0x17d   : > { %v2314_v35 = vpop.f32.mrf.mxu0  ;;  %2506 = vmatpush3.bf16.msra.mxu1 %v2777_v27  ;;  %v2786_v27 = vld [vmem:[%s3438_s24 + $0x18] sm:$0xff]   ;;  %2533 = vmatprep.subr.bf16.mxu0 %v2791_v31 }
 0x17e   : > { %2507 = vmatprep.subr.bf16.mxu1 %v2778_v33  ;;  %2534 = vmatpush3.bf16.msra.mxu0 %v2791_v31 }
 0x17f   : > { %v2315_v37 = vpop.f32.mrf.mxu0  ;;  %2535 = vmatprep.subr.bf16.mxu0 %v2792_v32 }
 0x180   : > { %v2316_v39 = vadd.f32 %v2315_v37, %v2314_v35  ;;  %v2794_v35 = vld [vmem:[#allocation12 + $0x20] sm:$0xff]   ;;  %v2796_v37 = vld [vmem:[#allocation13 + $0x38] sm:$0xff]  }
 0x181   : > { %v2317_v40 = vpop.f32.mrf.mxu0  ;;  %2508 = vmatpush3.bf16.msra.mxu1 %v2778_v33  ;;  %v2790_v33 = vld [vmem:[%s3438_s24 + $0x38] sm:$0xff]  }
 0x182   : > { %v754_v41 = vpack.c.bf16 %v2316_v39, %v2313_v38  ;;  %2509 = vmatprep.subr.bf16.mxu1 %v2779_v36  ;;  %2536 = vmatpush3.bf16.msra.mxu0 %v2792_v32  ;;  %v2797_v38 = vld [vmem:[#allocation13 + $0x30] sm:$0xff]  }
 0x183   : > { %v2318_v43 = vpop.f32.mrf.mxu0  ;;  %2537 = vmatprep.subr.bf16.mxu0 %v2793_v34  ;;  %v2798_v39 = vld [vmem:[#allocation12 + $0x10] sm:$0xff]  }
 0x184   : > { %2490 = vmatmul.mubr.bf16.gmra.mxu1 %v754_v41  ;;  %v2319_v47 = vadd.f32 %v2318_v43, %v2317_v40  ;;  %v2799_v40 = vld [vmem:[#allocation13 + $0x28] sm:$0xff]   ;;  %v2800_v41 = vld [vmem:[#allocation13 + $0x20] sm:$0xff]   ;;  %v2802_v43 = vld [vmem:[#allocation13 + $0x18] sm:$0xff]  }
 0x185   : > { %v2320_v44 = vpop.f32.mrf.mxu0  ;;  %2510 = vmatpush3.bf16.msra.mxu1 %v2779_v36  ;;  %v2795_v36 = vld [vmem:[#allocation12 + $0x18] sm:$0xff]  }
 0x186   : > { %2511 = vmatprep.subr.bf16.mxu1 %v2780_v42  ;;  %2538 = vmatpush3.bf16.msra.mxu0 %v2793_v34 }
 0x187   : > { %v2321_v46 = vpop.f32.mrf.mxu0  ;;  %2539 = vmatprep.subr.bf16.mxu0 %v2794_v35 }
 0x188   : > { %v2322_v48 = vadd.f32 %v2321_v46, %v2320_v44  ;;  %v2803_v44 = vld [vmem:[#allocation13 + $0x10] sm:$0xff]   ;;  %v2804_v46 = vld [vmem:[#allocation12] sm:$0xff]  }
 0x189   : > { %v2323_v49 = vpop.f32.mrf.mxu0  ;;  %2512 = vmatpush3.bf16.msra.mxu1 %v2780_v42  ;;  %v2801_v42 = vld [vmem:[#allocation12 + $0x8] sm:$0xff]  }
 0x18a   : > { %v755_v50 = vpack.c.bf16 %v2322_v48, %v2319_v47  ;;  %2513 = vmatprep.subr.bf16.mxu1 %v2781_v45  ;;  %2540 = vmatpush3.bf16.msra.mxu0 %v2794_v35  ;;  %v2806_v47 = vld [vmem:[#allocation13] sm:$0xff]  }
 0x18b   : > { %v2324_v52 = vpop.f32.mrf.mxu0  ;;  %2541 = vmatprep.subr.bf16.mxu0 %v2795_v36 }
 0x18c   : > { %2493 = vmatprep.mubr.bf16.mxu1 %v755_v50  ;;  %v2325_v55 = vadd.f32 %v2324_v52, %v2323_v49 }
 0x18d   : > { %v2326_v53 = vpop.f32.mrf.mxu0  ;;  %2514 = vmatpush3.bf16.msra.mxu1 %v2781_v45  ;;  %v2805_v45 = vld [vmem:[#allocation13 + $0x8] sm:$0xff]  }
 0x18e   : > { %2515 = vmatprep.subr.bf16.mxu1 %v2782_v51  ;;  %2542 = vmatpush3.bf16.msra.mxu0 %v2795_v36 }
 0x18f   : > { %v2327_v54 = vpop.f32.mrf.mxu0  ;;  %2543 = vmatprep.subr.bf16.mxu0 %v2798_v39 }
 0x190   : > { %v2328_v56 = vadd.f32 %v2327_v54, %v2326_v53 }
 0x191   : > { %v2329_v57 = vpop.f32.mrf.mxu0  ;;  %2516 = vmatpush3.bf16.msra.mxu1 %v2782_v51 }
 0x192   : > { %v756_v58 = vpack.c.bf16 %v2328_v56, %v2325_v55  ;;  %2565 = vmatprep.subr.bf16.mxu1 %v2796_v37  ;;  %2544 = vmatpush3.bf16.msra.mxu0 %v2798_v39 }
 0x193   : > { %v2330_v59 = vpop.f32.mrf.mxu0  ;;  %2545 = vmatprep.subr.bf16.mxu0 %v2801_v42 }
 0x194   : > { %2494 = vmatmul.mubr.bf16.gmra.mxu1 %v756_v58  ;;  %v2331_v62 = vadd.f32 %v2330_v59, %v2329_v57 }
 0x195   : > { %v2332_v60 = vpop.f32.mrf.mxu0 }
 0x196   : > { %2546 = vmatpush3.bf16.msra.mxu0 %v2801_v42 }
 0x197   : > { %v2333_v61 = vpop.f32.mrf.mxu0  ;;  %2547 = vmatprep.subr.bf16.mxu0 %v2804_v46 }
 0x198   : > { %v2334_v63 = vadd.f32 %v2333_v61, %v2332_v60 }
 0x199   : > { %v2335_v16 = vpop.f32.mrf.mxu0 }
 0x19a   : > { %v757_v17 = vpack.c.bf16 %v2334_v63, %v2331_v62  ;;  %2548 = vmatpush3.bf16.msra.mxu0 %v2804_v46 }
 0x19b   : > { %v2336_v18 = vpop.f32.mrf.mxu0 }
 0x19c   : > { %2497 = vmatprep.mubr.bf16.mxu1 %v757_v17  ;;  %v2337_v21 = vadd.f32 %v2336_v18, %v2335_v16 }
 0x19d   : > { %v2338_v19 = vpop.f32.mrf.mxu0 }
 0x19f   : > { %v2339_v20 = vpop.f32.mrf.mxu0 }
 0x1a0   : > { %v2340_v22 = vadd.f32 %v2339_v20, %v2338_v19 }
 0x1a2   : > { %v758_v24 = vpack.c.bf16 %v2340_v22, %v2337_v21  ;;  %v3459_v21 = vld [vmem:[%s3845_s4] ss:$0 sm:$0xff] }
 0x1a4   : > { %2498 = vmatmul.mubr.bf16.gmra.mxu1 %v758_v24 }
 0x1a5   : > { %2517 = vmatprep.mubr.bf16.mxu1 %v2783_v23 }
 0x1ac   : > { %2518 = vmatmul.mubr.bf16.vlgmr.msra.gmra.mxu1 %v2784_v25 }
 0x1ad   : > { %2521 = vmatprep.mubr.bf16.mxu1 %v2785_v26  ;;  %2566 = vmatpush3.bf16.msra.mxu1 %v2796_v37 }
 0x1ae   : > { %2567 = vmatprep.subr.bf16.mxu1 %v2797_v38 }
 0x1b1   : > { %2568 = vmatpush3.bf16.msra.mxu1 %v2797_v38 }
 0x1b2   : > { %2569 = vmatprep.subr.bf16.mxu1 %v2799_v40 }
 0x1b4   : > { %2522 = vmatmul.mubr.bf16.gmra.mxu1 %v2786_v27 }
 0x1b5   : > { %2525 = vmatprep.mubr.bf16.mxu1 %v2787_v28  ;;  %2570 = vmatpush3.bf16.msra.mxu1 %v2799_v40 }
 0x1b6   : > { %2571 = vmatprep.subr.bf16.mxu1 %v2800_v41 }
 0x1b9   : > { %2572 = vmatpush3.bf16.msra.mxu1 %v2800_v41 }
 0x1ba   : > { %2573 = vmatprep.subr.bf16.mxu1 %v2802_v43 }
 0x1bc   : > { %2526 = vmatmul.mubr.bf16.gmra.mxu1 %v2788_v29 }
 0x1bd   : > { %2529 = vmatprep.mubr.bf16.mxu1 %v2789_v30  ;;  %2574 = vmatpush3.bf16.msra.mxu1 %v2802_v43 }
 0x1be   : > { %2575 = vmatprep.subr.bf16.mxu1 %v2803_v44 }
 0x1c1   : > { %2576 = vmatpush3.bf16.msra.mxu1 %v2803_v44 }
 0x1c2   : > { %2577 = vmatprep.subr.bf16.mxu1 %v2805_v45 }
 0x1c4   : > { %2530 = vmatmul.mubr.bf16.gmra.mxu1 %v2790_v33 }
 0x1c5   : > { %2578 = vmatpush3.bf16.msra.mxu1 %v2805_v45 }
 0x1c6   : > { %2579 = vmatprep.subr.bf16.mxu1 %v2806_v47 }
 0x1c9   : > { %2580 = vmatpush3.bf16.msra.mxu1 %v2806_v47 }
 0x234   : > { %v2487_v48 = vpop.f32.mrf.mxu1 }
 0x236   : > { %v857_v49 = vpop.f32.mrf.mxu1 }
 0x238   : > { %v2488_v50 = vpop.f32.mrf.mxu1 }
 0x23a   : > { %v860_v51 = vpop.f32.mrf.mxu1 }
 0x244   : > { %v2491_v52 = vpop.f32.mrf.mxu1 }
 0x246   : > { %v873_v53 = vpop.f32.mrf.mxu1 }
 0x248   : > { %v2492_v54 = vpop.f32.mrf.mxu1 }
 0x24a   : > { %v876_v55 = vpop.f32.mrf.mxu1 }
 0x254   : > { %v2495_v56 = vpop.f32.mrf.mxu1 }
 0x256   : > { %v889_v57 = vpop.f32.mrf.mxu1 }
 0x258   : > { %v2496_v58 = vpop.f32.mrf.mxu1 }
 0x25a   : > { %v892_v59 = vpop.f32.mrf.mxu1 }
 0x264   : > { %v3448_v60 = vpop.f32.mrf.mxu1 }
 0x266   : > { %v3450_v61 = vpop.f32.mrf.mxu1 }
 0x268   : > { %v3452_v62 = vpop.f32.mrf.mxu1 }
 0x26a   : > { %v3454_v63 = vpop.f32.mrf.mxu1 }
 0x26c   : > { %v2519_v16 = vpop.f32.mrf.mxu1 }
 0x26d   : > { %v1059_v19 = vadd.f32 %v2519_v16, %v2487_v48 }
 0x26e   : > { %v1050_v17 = vpop.f32.mrf.mxu1 }
 0x26f   : > { %v1051_v18 = vadd.f32 %v1050_v17, %v857_v49  ;;  %v1122_v27 = vadd.f32 %v3459_v21, %v1059_v19 }
 0x270   : > { %v2520_v20 = vpop.f32.mrf.mxu1 }
 0x271   : > { %v1062_v22 = vadd.f32 %v2520_v20, %v2488_v50  ;;  %v1120_v24 = vadd.f32 %v3459_v21, %v1051_v18  ;;  %v1138_v35 = vmax.f32 %v1122_v27, 0.0 }
 0x272   : > { %v1053_v23 = vpop.f32.mrf.mxu1 }
 0x273   : > { %v1123_v25 = vadd.f32 %v3459_v21, %v1062_v22  ;;  %v1054_v26 = vadd.f32 %v1053_v23, %v860_v51  ;;  %v1136_v32 = vmax.f32 %v1120_v24, 0.0 }
 0x274   : > { %v2523_v28 = vpop.f32.mrf.mxu1 }
 0x275   : > { %v1121_v29 = vadd.f32 %v3459_v21, %v1054_v26  ;;  %v1139_v30 = vmax.f32 %v1123_v25, 0.0  ;;  %v1075_v36 = vadd.f32 %v2523_v28, %v2491_v52 }
 0x276   : > { %v1066_v31 = vpop.f32.mrf.mxu1 }
 0x277   : > { %v1137_v33 = vmax.f32 %v1121_v29, 0.0  ;;  %v1067_v34 = vadd.f32 %v1066_v31, %v873_v53  ;;  %v1153_v40 = vpack.c.bf16 %v1139_v30, %v1138_v35  ;;  %v1126_v45 = vadd.f32 %v3459_v21, %v1075_v36 }
 0x278   : > { %v2524_v37 = vpop.f32.mrf.mxu1 }
 0x279   : > { %v1078_v38 = vadd.f32 %v2524_v37, %v2492_v54  ;;  %v1152_v39 = vpack.c.bf16 %v1137_v33, %v1136_v32  ;;  %v1124_v42 = vadd.f32 %v3459_v21, %v1067_v34  ;;  %v1142_v53 = vmax.f32 %v1126_v45, 0.0 }
 0x27a   : > { %v1069_v41 = vpop.f32.mrf.mxu1 }
 0x27b   : > { %v1127_v43 = vadd.f32 %v3459_v21, %v1078_v38  ;;  %v1070_v44 = vadd.f32 %v1069_v41, %v876_v55  ;;  %2549 = vmatprep.mubr.bf16.mxu0 %v1152_v39  ;;  %2581 = vmatprep.mubr.bf16.mxu1 %v1152_v39  ;;  %v1140_v50 = vmax.f32 %v1124_v42, 0.0 }
 0x27c   : > { %v2527_v46 = vpop.f32.mrf.mxu1  ;;  %2550 = vmatmul.mubr.bf16.vlgmr.msra.gmra.mxu0 %v1153_v40  ;;  %2582 = vmatmul.mubr.bf16.vlgmr.msra.gmra.mxu1 %v1153_v40 }
 0x27d   : > { %v1125_v47 = vadd.f32 %v3459_v21, %v1070_v44  ;;  %v1143_v48 = vmax.f32 %v1127_v43, 0.0  ;;  %v1091_v54 = vadd.f32 %v2527_v46, %v2495_v56 }
 0x27e   : > { %v1082_v49 = vpop.f32.mrf.mxu1 }
 0x27f   : > { %v1141_v51 = vmax.f32 %v1125_v47, 0.0  ;;  %v1083_v52 = vadd.f32 %v1082_v49, %v889_v57  ;;  %v1155_v19 = vpack.c.bf16 %v1143_v48, %v1142_v53  ;;  %v1130_v24 = vadd.f32 %v3459_v21, %v1091_v54 }
 0x280   : > { %v2528_v16 = vpop.f32.mrf.mxu1 }
 0x281   : > { %v1094_v17 = vadd.f32 %v2528_v16, %v2496_v58  ;;  %v1154_v18 = vpack.c.bf16 %v1141_v51, %v1140_v50  ;;  %v1128_v20 = vadd.f32 %v3459_v21, %v1083_v52  ;;  %v1146_v29 = vmax.f32 %v1130_v24, 0.0 }
 0x282   : > { %v1085_v55 = vpop.f32.mrf.mxu1 }
 0x283   : > { %v1131_v22 = vadd.f32 %v3459_v21, %v1094_v17  ;;  %v1086_v23 = vadd.f32 %v1085_v55, %v892_v59  ;;  %2553 = vmatprep.mubr.bf16.mxu0 %v1154_v18  ;;  %2585 = vmatprep.mubr.bf16.mxu1 %v1154_v18  ;;  %v1144_v58 = vmax.f32 %v1128_v20, 0.0 }
 0x284   : > { %v2531_v25 = vpop.f32.mrf.mxu1  ;;  %2554 = vmatmul.mubr.bf16.gmra.mxu0 %v1155_v19  ;;  %2586 = vmatmul.mubr.bf16.gmra.mxu1 %v1155_v19 }
 0x285   : > { %v1129_v57 = vadd.f32 %v3459_v21, %v1086_v23  ;;  %v1147_v56 = vmax.f32 %v1131_v22, 0.0  ;;  %v1107_v30 = vadd.f32 %v2531_v25, %v3448_v60 }
 0x286   : > { %v1098_v26 = vpop.f32.mrf.mxu1 }
 0x287   : > { %v1145_v27 = vmax.f32 %v1129_v57, 0.0  ;;  %v1099_v28 = vadd.f32 %v1098_v26, %v3450_v61  ;;  %v1157_v34 = vpack.c.bf16 %v1147_v56, %v1146_v29  ;;  %v1134_v38 = vadd.f32 %v3459_v21, %v1107_v30 }
 0x288   : > { %v2532_v31 = vpop.f32.mrf.mxu1 }
 0x289   : > { %v1110_v59 = vadd.f32 %v2532_v31, %v3452_v62  ;;  %v1156_v32 = vpack.c.bf16 %v1145_v27, %v1144_v58  ;;  %v1132_v35 = vadd.f32 %v3459_v21, %v1099_v28  ;;  %v1150_v40 = vmax.f32 %v1134_v38, 0.0 }
 0x28a   : > { %v1101_v33 = vpop.f32.mrf.mxu1 }
 0x28b   : > { %v1135_v36 = vadd.f32 %v3459_v21, %v1110_v59  ;;  %v1102_v37 = vadd.f32 %v1101_v33, %v3454_v63  ;;  %2557 = vmatprep.mubr.bf16.mxu0 %v1156_v32  ;;  %2589 = vmatprep.mubr.bf16.mxu1 %v1156_v32  ;;  %v1148_v62 = vmax.f32 %v1132_v35, 0.0 }
 0x28c   : > { %2558 = vmatmul.mubr.bf16.gmra.mxu0 %v1157_v34  ;;  %2590 = vmatmul.mubr.bf16.gmra.mxu1 %v1157_v34 }
 0x28d   : > { %v1133_v60 = vadd.f32 %v3459_v21, %v1102_v37  ;;  %v1151_v61 = vmax.f32 %v1135_v36, 0.0 }
 0x28f   : > { %v1149_v39 = vmax.f32 %v1133_v60, 0.0  ;;  %v1159_v42 = vpack.c.bf16 %v1151_v61, %v1150_v40 }
 0x291   : > { %v1158_v41 = vpack.c.bf16 %v1149_v39, %v1148_v62 }
 0x293   : > { %2561 = vmatprep.mubr.bf16.mxu0 %v1158_v41  ;;  %2593 = vmatprep.mubr.bf16.mxu1 %v1158_v41 }
 0x294   : > { %2562 = vmatmul.mubr.bf16.gmra.mxu0 %v1159_v42  ;;  %2594 = vmatmul.mubr.bf16.gmra.mxu1 %v1159_v42 }
 0x33c   : > { %v2551_v63 = vpop.f32.mrf.mxu0  ;;  %v2583_v43 = vpop.f32.mrf.mxu1 }
 0x33d   : > { %1485 = vst [vmem:[%s3482_s14 + $0x10] sm:$0xff] %v2551_v63  ;;  %1518 = vst [vmem:[%s3401_s22 + $0x10] sm:$0xff] %v2551_v63 }
 0x33e   : > { %1502 = vst [vmem:[%s3487_s18 + $0x10] sm:$0xff] %v2583_v43  ;;  %v1258_v21 = vpop.f32.mrf.mxu0  ;;  %v1419_v44 = vpop.f32.mrf.mxu1 }
 0x33f   : > { %1483 = vst [vmem:[%s3482_s14] sm:$0xff] %v1258_v21  ;;  %1516 = vst [vmem:[%s3401_s22] sm:$0xff] %v1258_v21 }
 0x340   : > { %1500 = vst [vmem:[%s3487_s18] sm:$0xff] %v1419_v44  ;;  %v2552_v45 = vpop.f32.mrf.mxu0  ;;  %v2584_v46 = vpop.f32.mrf.mxu1 }
 0x341   : > { %1486 = vst [vmem:[%s3482_s14 + $0x18] sm:$0xff] %v2552_v45  ;;  %1519 = vst [vmem:[%s3401_s22 + $0x18] sm:$0xff] %v2552_v45 }
 0x342   : > { %1503 = vst [vmem:[%s3487_s18 + $0x18] sm:$0xff] %v2584_v46  ;;  %v1261_v47 = vpop.f32.mrf.mxu0  ;;  %v1422_v48 = vpop.f32.mrf.mxu1 }
 0x343   : > { %1484 = vst [vmem:[%s3482_s14 + $0x8] sm:$0xff] %v1261_v47  ;;  %1517 = vst [vmem:[%s3401_s22 + $0x8] sm:$0xff] %v1261_v47 }
 0x344   : > { %1501 = vst [vmem:[%s3487_s18 + $0x8] sm:$0xff] %v1422_v48  ;;  %v2555_v49 = vpop.f32.mrf.mxu0  ;;  %v2587_v50 = vpop.f32.mrf.mxu1 }
 0x345   : > { %1489 = vst [vmem:[%s3482_s14 + $0x30] sm:$0xff] %v2555_v49  ;;  %1522 = vst [vmem:[%s3401_s22 + $0x30] sm:$0xff] %v2555_v49 }
 0x346   : > { %1506 = vst [vmem:[%s3487_s18 + $0x30] sm:$0xff] %v2587_v50  ;;  %v1274_v51 = vpop.f32.mrf.mxu0  ;;  %v1435_v52 = vpop.f32.mrf.mxu1 }
 0x347   : > { %1487 = vst [vmem:[%s3482_s14 + $0x20] sm:$0xff] %v1274_v51  ;;  %1520 = vst [vmem:[%s3401_s22 + $0x20] sm:$0xff] %v1274_v51 }
 0x348   : > { %1504 = vst [vmem:[%s3487_s18 + $0x20] sm:$0xff] %v1435_v52  ;;  %v2556_v53 = vpop.f32.mrf.mxu0  ;;  %v2588_v54 = vpop.f32.mrf.mxu1 }
 0x349   : > { %1490 = vst [vmem:[%s3482_s14 + $0x38] sm:$0xff] %v2556_v53  ;;  %1523 = vst [vmem:[%s3401_s22 + $0x38] sm:$0xff] %v2556_v53 }
 0x34a   : > { %1507 = vst [vmem:[%s3487_s18 + $0x38] sm:$0xff] %v2588_v54  ;;  %v1277_v16 = vpop.f32.mrf.mxu0  ;;  %v1438_v17 = vpop.f32.mrf.mxu1 }
 0x34b   : > { %1488 = vst [vmem:[%s3482_s14 + $0x28] sm:$0xff] %v1277_v16  ;;  %1521 = vst [vmem:[%s3401_s22 + $0x28] sm:$0xff] %v1277_v16 }
 0x34c   : > { %1505 = vst [vmem:[%s3487_s18 + $0x28] sm:$0xff] %v1438_v17  ;;  %v2559_v18 = vpop.f32.mrf.mxu0  ;;  %v2591_v55 = vpop.f32.mrf.mxu1 }
 0x34d   : > { %1493 = vst [vmem:[%s3482_s14 + $0x50] sm:$0xff] %v2559_v18  ;;  %1526 = vst [vmem:[%s3401_s22 + $0x50] sm:$0xff] %v2559_v18 }
 0x34e   : > { %1510 = vst [vmem:[%s3487_s18 + $0x50] sm:$0xff] %v2591_v55  ;;  %v1290_v19 = vpop.f32.mrf.mxu0  ;;  %v1451_v20 = vpop.f32.mrf.mxu1 }
 0x34f   : > { %1491 = vst [vmem:[%s3482_s14 + $0x40] sm:$0xff] %v1290_v19  ;;  %1524 = vst [vmem:[%s3401_s22 + $0x40] sm:$0xff] %v1290_v19 }
 0x350   : > { %1508 = vst [vmem:[%s3487_s18 + $0x40] sm:$0xff] %v1451_v20  ;;  %v2560_v22 = vpop.f32.mrf.mxu0  ;;  %v2592_v23 = vpop.f32.mrf.mxu1 }
 0x351   : > { %1494 = vst [vmem:[%s3482_s14 + $0x58] sm:$0xff] %v2560_v22  ;;  %1527 = vst [vmem:[%s3401_s22 + $0x58] sm:$0xff] %v2560_v22 }
 0x352   : > { %1511 = vst [vmem:[%s3487_s18 + $0x58] sm:$0xff] %v2592_v23  ;;  %v1293_v24 = vpop.f32.mrf.mxu0  ;;  %v1454_v25 = vpop.f32.mrf.mxu1 }
 0x353   : > { %1492 = vst [vmem:[%s3482_s14 + $0x48] sm:$0xff] %v1293_v24  ;;  %1525 = vst [vmem:[%s3401_s22 + $0x48] sm:$0xff] %v1293_v24 }
 0x354   : > { %1509 = vst [vmem:[%s3487_s18 + $0x48] sm:$0xff] %v1454_v25  ;;  %v2563_v57 = vpop.f32.mrf.mxu0  ;;  %v2595_v56 = vpop.f32.mrf.mxu1 }
 0x355   : > { %1497 = vst [vmem:[%s3482_s14 + $0x70] sm:$0xff] %v2563_v57  ;;  %1530 = vst [vmem:[%s3401_s22 + $0x70] sm:$0xff] %v2563_v57 }
 0x356   : > { %1514 = vst [vmem:[%s3487_s18 + $0x70] sm:$0xff] %v2595_v56  ;;  %v1306_v26 = vpop.f32.mrf.mxu0  ;;  %v1467_v58 = vpop.f32.mrf.mxu1 }
 0x357   : > { %1495 = vst [vmem:[%s3482_s14 + $0x60] sm:$0xff] %v1306_v26  ;;  %1528 = vst [vmem:[%s3401_s22 + $0x60] sm:$0xff] %v1306_v26 }
 0x358   : > { %1512 = vst [vmem:[%s3487_s18 + $0x60] sm:$0xff] %v1467_v58  ;;  %v2564_v27 = vpop.f32.mrf.mxu0  ;;  %v2596_v28 = vpop.f32.mrf.mxu1 }
 0x359   : > { %1498 = vst [vmem:[%s3482_s14 + $0x78] sm:$0xff] %v2564_v27  ;;  %1531 = vst [vmem:[%s3401_s22 + $0x78] sm:$0xff] %v2564_v27 }
 0x35a   : > { %1515 = vst [vmem:[%s3487_s18 + $0x78] sm:$0xff] %v2596_v28  ;;  %v1309_v29 = vpop.f32.mrf.mxu0  ;;  %v1470_v30 = vpop.f32.mrf.mxu1 }
 0x35b   : > { %1496 = vst [vmem:[%s3482_s14 + $0x68] sm:$0xff] %v1309_v29  ;;  %1529 = vst [vmem:[%s3401_s22 + $0x68] sm:$0xff] %v1309_v29 }
 0x35c   : > { %1513 = vst [vmem:[%s3487_s18 + $0x68] sm:$0xff] %v1470_v30 }
 0x35d PF: > { %p2252_p12 = scmp.ne.s32.totalorder %s3123_s9, 1 }
 0x35e   : > { %s3569_s9 = scalar_lea.vmem (!%p2252_p12), [#allocation2], %s3362_s23 }
 0x35f   : > { %1535 = sbr.rel (%p2252_p12) target bundleno = 1455 (0x5af), region = 84 }
 0x364   : > { %v1583_v31 = vld [vmem:[#allocation3 + $0xf0] sm:$0xff]  ;;  %v1584_v59 = vld [vmem:[#allocation3 + $0xf8] sm:$0xff]  ;;  %v2254_v33 = vcombine.high %v3369_v0, %v3371_v1  ;;  %v2262_v34 = vcombine.high %v3385_v8, %v3387_v9  ;;  %v1581_v37 = vld [vmem:[#allocation3 + $0xe0] sm:$0xff] }
 0x365   : > { %v1567_v32 = vld [vmem:[#allocation3 + $0x70] sm:$0xff]  ;;  %v1600_v35 = vpack.c.bf16 %v1584_v59, %v1583_v31  ;;  %v1568_v36 = vld [vmem:[#allocation3 + $0x78] sm:$0xff]  ;;  %v1582_v38 = vld [vmem:[#allocation3 + $0xe8] sm:$0xff] }
 0x366   : > { %v1592_v60 = vpack.c.bf16 %v1568_v36, %v1567_v32  ;;  %v1599_v61 = vpack.c.bf16 %v1582_v38, %v1581_v37  ;;  %v1565_v62 = vld [vmem:[#allocation3 + $0x60] sm:$0xff]  ;;  %v1566_v39 = vld [vmem:[#allocation3 + $0x68] sm:$0xff]  ;;  %v1579_v40 = vld [vmem:[#allocation3 + $0xd0] sm:$0xff]  ;;  %1713 = vmatprep.mubr.bf16.mxu0 %v2254_v33  ;;  %1745 = vmatprep.mubr.bf16.mxu1 %v2262_v34  ;;  %v2253_v32 = vcombine.low %v3369_v0, %v3371_v1 }
 0x367   : > { %2405 = vmatprep.subr.bf16.mxu0 %v1600_v35  ;;  %2597 = vmatprep.subr.bf16.mxu1 %v1600_v35  ;;  %v1580_v41 = vld [vmem:[#allocation3 + $0xd8] sm:$0xff]  ;;  %v1591_v42 = vpack.c.bf16 %v1566_v39, %v1565_v62  ;;  %v1563_v43 = vld [vmem:[#allocation3 + $0x50] sm:$0xff]  ;;  %v1577_v44 = vld [vmem:[#allocation3 + $0xc0] sm:$0xff]  ;;  %v2261_v33 = vcombine.low %v3385_v8, %v3387_v9  ;;  %v2256_v34 = vcombine.high %v3373_v2, %v3375_v3 }
 0x368   : > { %2406 = vmatpush3.bf16.msra.mxu0 %v1592_v60  ;;  %2605 = vmatpush3.bf16.msra.mxu1 %v1592_v60  ;;  %v1598_v63 = vpack.c.bf16 %v1580_v41, %v1579_v40  ;;  %v1564_v21 = vld [vmem:[#allocation3 + $0x58] sm:$0xff]  ;;  %v1578_v45 = vld [vmem:[#allocation3 + $0xc8] sm:$0xff]  ;;  %v1561_v48 = vld [vmem:[#allocation3 + $0x40] sm:$0xff]  ;;  %v2264_v35 = vcombine.high %v3389_v10, %v3391_v11  ;;  %v2255_v36 = vcombine.low %v3373_v2, %v3375_v3 }
 0x369   : > { %2407 = vmatprep.subr.bf16.mxu0 %v1599_v61  ;;  %2598 = vmatprep.subr.bf16.mxu1 %v1599_v61  ;;  %v1590_v46 = vpack.c.bf16 %v1564_v21, %v1563_v43  ;;  %v1597_v47 = vpack.c.bf16 %v1578_v45, %v1577_v44  ;;  %v1562_v49 = vld [vmem:[#allocation3 + $0x48] sm:$0xff]  ;;  %v1575_v50 = vld [vmem:[#allocation3 + $0xb0] sm:$0xff]  ;;  %v1576_v51 = vld [vmem:[#allocation3 + $0xb8] sm:$0xff]  ;;  %v2263_v0 = vcombine.low %v3389_v10, %v3391_v11 }
 0x36a   : > { %v1589_v52 = vpack.c.bf16 %v1562_v49, %v1561_v48  ;;  %v1596_v53 = vpack.c.bf16 %v1576_v51, %v1575_v50  ;;  %v1559_v54 = vld [vmem:[#allocation3 + $0x30] sm:$0xff]  ;;  %v1560_v16 = vld [vmem:[#allocation3 + $0x38] sm:$0xff]  ;;  %v1573_v17 = vld [vmem:[#allocation3 + $0xa0] sm:$0xff]  ;;  %v2258_v1 = vcombine.high %v3377_v4, %v3379_v5  ;;  %v2266_v8 = vcombine.high %v3393_v12, %v3395_v13 }
 0x36b   : > { %v1574_v18 = vld [vmem:[#allocation3 + $0xa8] sm:$0xff]  ;;  %v1588_v55 = vpack.c.bf16 %v1560_v16, %v1559_v54  ;;  %v1557_v20 = vld [vmem:[#allocation3 + $0x20] sm:$0xff]  ;;  %v1571_v23 = vld [vmem:[#allocation3 + $0x90] sm:$0xff]  ;;  %v2257_v9 = vcombine.low %v3377_v4, %v3379_v5  ;;  %v2265_v2 = vcombine.low %v3393_v12, %v3395_v13  ;;  %v2260_v3 = vcombine.high %v3381_v6, %v3383_v7 }
 0x36c   : > { %2408 = vmatpush3.bf16.msra.mxu0 %v1591_v42  ;;  %2606 = vmatpush3.bf16.msra.mxu1 %v1591_v42  ;;  %v1595_v19 = vpack.c.bf16 %v1574_v18, %v1573_v17  ;;  %v1558_v22 = vld [vmem:[#allocation3 + $0x28] sm:$0xff]  ;;  %v1572_v24 = vld [vmem:[#allocation3 + $0x98] sm:$0xff]  ;;  %v1555_v56 = vld [vmem:[#allocation3 + $0x10] sm:$0xff]  ;;  %v2268_v10 = vcombine.high %v3397_v14, %v3399_v15  ;;  %v2259_v11 = vcombine.low %v3381_v6, %v3383_v7  ;;  %v1817_v4 = vlaneseq }
 0x36d   : > { %2409 = vmatprep.subr.bf16.mxu0 %v1598_v63  ;;  %2599 = vmatprep.subr.bf16.mxu1 %v1598_v63  ;;  %v1587_v25 = vpack.c.bf16 %v1558_v22, %v1557_v20  ;;  %v1594_v57 = vpack.c.bf16 %v1572_v24, %v1571_v23  ;;  %v1556_v26 = vld [vmem:[#allocation3 + $0x18] sm:$0xff]  ;;  %v1569_v58 = vld [vmem:[#allocation3 + $0x80] sm:$0xff]  ;;  %v1570_v27 = vld [vmem:[#allocation3 + $0x88] sm:$0xff]  ;;  %v2267_v37 = vcombine.low %v3397_v14, %v3399_v15 }
 0x36e   : > { %v1586_v28 = vpack.c.bf16 %v1556_v26, %v1555_v56  ;;  %v1593_v29 = vpack.c.bf16 %v1570_v27, %v1569_v58  ;;  %v1553_v30 = vld [vmem:[#allocation3] sm:$0xff]  ;;  %v1554_v31 = vld [vmem:[#allocation3 + $0x8] sm:$0xff]  ;;  %v3573_v62 = vand.u32 127, %v1817_v4  ;;  %v1547_v16 = vld [vmem:[%s3569_s9 + $0x50] sm:$0xff] }
 0x36f   : > { %v1585_v59 = vpack.c.bf16 %v1554_v31, %v1553_v30  ;;  %v1537_v13 = vld [vmem:[%s3569_s9] sm:$0xff]  ;;  %v1538_v42 = vld [vmem:[%s3569_s9 + $0x8] sm:$0xff]  ;;  %v1540_v26 = vld [vmem:[%s3569_s9 + $0x18] sm:$0xff] }
 0x370   : > { %2410 = vmatpush3.bf16.msra.mxu0 %v1590_v46  ;;  %2607 = vmatpush3.bf16.msra.mxu1 %v1590_v46  ;;  %v1545_v60 = vld [vmem:[%s3569_s9 + $0x40] sm:$0xff]  ;;  %v1546_v43 = vld [vmem:[%s3569_s9 + $0x48] sm:$0xff]  ;;  %vm1819_vm0 = vcmp.lt.s32.totalorder %v3573_v62, 8  ;;  %v1548_v27 = vld [vmem:[%s3569_s9 + $0x58] sm:$0xff] }
 0x371   : > { %2411 = vmatprep.subr.bf16.mxu0 %v1597_v47  ;;  %2600 = vmatprep.subr.bf16.mxu1 %v1597_v47  ;;  %v3578_v39 = vld [vmem:[%s3848_s7] ss:$0 sm:$0xff] }
 0x374   : > { %2412 = vmatpush3.bf16.msra.mxu0 %v1589_v52  ;;  %2608 = vmatpush3.bf16.msra.mxu1 %v1589_v52 }
 0x375   : > { %2413 = vmatprep.subr.bf16.mxu0 %v1596_v53  ;;  %2601 = vmatprep.subr.bf16.mxu1 %v1596_v53  ;;  %v1539_v53 = vld [vmem:[%s3569_s9 + $0x10] sm:$0xff] }
 0x378   : > { %2414 = vmatpush3.bf16.msra.mxu0 %v1588_v55  ;;  %2609 = vmatpush3.bf16.msra.mxu1 %v1588_v55 }
 0x379   : > { %2415 = vmatprep.subr.bf16.mxu0 %v1595_v19  ;;  %2602 = vmatprep.subr.bf16.mxu1 %v1595_v19 }
 0x37c   : > { %2416 = vmatpush3.bf16.msra.mxu0 %v1587_v25  ;;  %2610 = vmatpush3.bf16.msra.mxu1 %v1587_v25 }
 0x37d   : > { %2417 = vmatprep.subr.bf16.mxu0 %v1594_v57  ;;  %2603 = vmatprep.subr.bf16.mxu1 %v1594_v57 }
 0x380   : > { %2418 = vmatpush3.bf16.msra.mxu0 %v1586_v28  ;;  %2611 = vmatpush3.bf16.msra.mxu1 %v1586_v28 }
 0x381   : > { %2419 = vmatprep.subr.bf16.mxu0 %v1593_v29  ;;  %2604 = vmatprep.subr.bf16.mxu1 %v1593_v29 }
 0x384   : > { %2420 = vmatpush3.bf16.msra.mxu0 %v1585_v59  ;;  %2612 = vmatpush3.bf16.msra.mxu1 %v1585_v59 }
 0x387   : > { %1714 = vmatmul.mubr.bf16.vlgmr.msra.gmra.mxu0 %v2253_v32  ;;  %1746 = vmatmul.mubr.bf16.vlgmr.msra.gmra.mxu1 %v2261_v33 }
 0x388   : > { %1721 = vmatprep.mubr.bf16.mxu0 %v2256_v34  ;;  %1753 = vmatprep.mubr.bf16.mxu1 %v2264_v35 }
 0x38f   : > { %1722 = vmatmul.mubr.bf16.gmra.mxu0 %v2255_v36  ;;  %1754 = vmatmul.mubr.bf16.gmra.mxu1 %v2263_v0 }
 0x390   : > { %1729 = vmatprep.mubr.bf16.mxu0 %v2258_v1  ;;  %1761 = vmatprep.mubr.bf16.mxu1 %v2266_v8  ;;  %v1541_v1 = vld [vmem:[%s3569_s9 + $0x20] sm:$0xff] }
 0x397   : > { %1730 = vmatmul.mubr.bf16.gmra.mxu0 %v2257_v9  ;;  %1762 = vmatmul.mubr.bf16.gmra.mxu1 %v2265_v2  ;;  %v1549_v9 = vld [vmem:[%s3569_s9 + $0x60] sm:$0xff] }
 0x398   : > { %1737 = vmatprep.mubr.bf16.mxu0 %v2260_v3  ;;  %1769 = vmatprep.mubr.bf16.mxu1 %v2268_v10 }
 0x39f   : > { %1738 = vmatmul.mubr.bf16.gmra.mxu0 %v2259_v11  ;;  %1770 = vmatmul.mubr.bf16.gmra.mxu1 %v2267_v37 }
 0x447   : > { %v2421_v5 = vpop.f32.mrf.mxu0  ;;  %v2445_v12 = vpop.f32.mrf.mxu1 }
 0x449   : > { %v2422_v38 = vpop.f32.mrf.mxu0  ;;  %v2446_v61 = vpop.f32.mrf.mxu1 }
 0x44a   : > { %v2423_v6 = vadd.f32 %v2422_v38, %v2421_v5  ;;  %v2447_v7 = vadd.f32 %v2446_v61, %v2445_v12  ;;  %v1542_v61 = vld [vmem:[%s3569_s9 + $0x28] sm:$0xff] }
 0x44b   : > { %v2424_v14 = vpop.f32.mrf.mxu0  ;;  %v2448_v15 = vpop.f32.mrf.mxu1 }
 0x44c   : > { %v1778_v40 = vadd.f32 %v2423_v6, %v1537_v13  ;;  %v1786_v41 = vadd.f32 %v2447_v7, %v1545_v60  ;;  %v1550_v7 = vld [vmem:[%s3569_s9 + $0x68] sm:$0xff] }
 0x44d   : > { %v2425_v63 = vpop.f32.mrf.mxu0  ;;  %v2449_v21 = vpop.f32.mrf.mxu1 }
 0x44e   : > { %v2426_v44 = vadd.f32 %v2425_v63, %v2424_v14  ;;  %v2450_v45 = vadd.f32 %v2449_v21, %v2448_v15  ;;  %v1801_v46 = vadd.f32 %v3578_v39, %v1778_v40  ;;  %v1809_v49 = vadd.f32 %v3578_v39, %v1786_v41 }
 0x44f   : > { %v2427_v47 = vpop.f32.mrf.mxu0  ;;  %v2451_v48 = vpop.f32.mrf.mxu1 }
 0x450   : > { %v1779_v50 = vadd.f32 %v2426_v44, %v1538_v42  ;;  %v1787_v51 = vadd.f32 %v2450_v45, %v1546_v43  ;;  %v3587_v52 = vsel %vm1819_vm0, %v1801_v46, -1e+30  ;;  %v3595_v23 = vsel %vm1819_vm0, %v1809_v49, -1e+30  ;;  %v1551_v49 = vld [vmem:[%s3569_s9 + $0x70] sm:$0xff] }
 0x451   : > { %v2428_v54 = vpop.f32.mrf.mxu0  ;;  %1836 = vmax.xlane.f32.xlu0 %v3587_v52  ;;  %v2452_v17 = vpop.f32.mrf.mxu1 }
 0x452   : > { %v2429_v18 = vadd.f32 %v2428_v54, %v2427_v47  ;;  %v2453_v55 = vadd.f32 %v2452_v17, %v2451_v48  ;;  %v1810_v19 = vadd.f32 %v3578_v39, %v1787_v51  ;;  %v1802_v56 = vadd.f32 %v3578_v39, %v1779_v50  ;;  %v1543_v47 = vld [vmem:[%s3569_s9 + $0x30] sm:$0xff] }
 0x453   : > { %v2430_v20 = vpop.f32.mrf.mxu0  ;;  %v2454_v22 = vpop.f32.mrf.mxu1 }
 0x454   : > { %v1780_v24 = vadd.f32 %v2429_v18, %v1539_v53  ;;  %v1788_v25 = vadd.f32 %v2453_v55, %v1547_v16  ;;  %v3599_v57 = vsel %vm1819_vm0, %v1810_v19, -1e+30  ;;  %v3614_v0 = vsel %vm1819_vm0, %v1802_v56, -1e+30  ;;  %v1552_v56 = vld [vmem:[%s3569_s9 + $0x78] sm:$0xff] }
 0x455   : > { %v2431_v58 = vpop.f32.mrf.mxu0  ;;  %1854 = vmax.xlane.f32.xlu1 %v3599_v57  ;;  %1852 = vmax.xlane.f32.xlu0 %v3595_v23  ;;  %v2455_v28 = vpop.f32.mrf.mxu1 }
 0x456   : > { %v2432_v29 = vadd.f32 %v2431_v58, %v2430_v20  ;;  %v2456_v30 = vadd.f32 %v2455_v28, %v2454_v22  ;;  %v1803_v31 = vadd.f32 %v3578_v39, %v1780_v24  ;;  %v1811_v59 = vadd.f32 %v3578_v39, %v1788_v25  ;;  %v1544_v24 = vld [vmem:[%s3569_s9 + $0x38] sm:$0xff] }
 0x457   : > { %v2433_v32 = vpop.f32.mrf.mxu0  ;;  %v2457_v33 = vpop.f32.mrf.mxu1 }
 0x458   : > { %v1781_v34 = vadd.f32 %v2432_v29, %v1540_v26  ;;  %v1789_v35 = vadd.f32 %v2456_v30, %v1548_v27  ;;  %v3610_v36 = vsel %vm1819_vm0, %v1803_v31, -1e+30  ;;  %v3623_v37 = vsel %vm1819_vm0, %v1811_v59, -1e+30 }
 0x459   : > { %v2434_v8 = vpop.f32.mrf.mxu0  ;;  %1840 = vmax.xlane.f32.xlu1 %v3610_v36  ;;  %1838 = vmax.xlane.f32.xlu0 %v3614_v0  ;;  %v2458_v2 = vpop.f32.mrf.mxu1 }
 0x45a   : > { %v2435_v3 = vadd.f32 %v2434_v8, %v2433_v32  ;;  %v2459_v10 = vadd.f32 %v2458_v2, %v2457_v33  ;;  %v1804_v11 = vadd.f32 %v3578_v39, %v1781_v34  ;;  %v1812_v60 = vadd.f32 %v3578_v39, %v1789_v35 }
 0x45b   : > { %v2436_v4 = vpop.f32.mrf.mxu0  ;;  %v2460_v5 = vpop.f32.mrf.mxu1 }
 0x45c   : > { %v1782_v12 = vadd.f32 %v2435_v3, %v1541_v1  ;;  %v1790_v13 = vadd.f32 %v2459_v10, %v1549_v9  ;;  %v3627_v38 = vsel %vm1819_vm0, %v1804_v11, -1e+30  ;;  %v3638_v45 = vsel %vm1819_vm0, %v1812_v60, -1e+30 }
 0x45d   : > { %v2437_v6 = vpop.f32.mrf.mxu0  ;;  %1842 = vmax.xlane.f32.xlu1 %v3627_v38  ;;  %1856 = vmax.xlane.f32.xlu0 %v3623_v37  ;;  %v2461_v14 = vpop.f32.mrf.mxu1 }
 0x45e   : > { %v2438_v15 = vadd.f32 %v2437_v6, %v2436_v4  ;;  %v2462_v40 = vadd.f32 %v2461_v14, %v2460_v5  ;;  %v1805_v41 = vadd.f32 %v3578_v39, %v1782_v12  ;;  %v1813_v42 = vadd.f32 %v3578_v39, %v1790_v13 }
 0x45f   : > { %v2439_v63 = vpop.f32.mrf.mxu0  ;;  %v2463_v43 = vpop.f32.mrf.mxu1 }
 0x460   : > { %v1783_v21 = vadd.f32 %v2438_v15, %v1542_v61  ;;  %v1791_v44 = vadd.f32 %v2462_v40, %v1550_v7  ;;  %v3642_v46 = vsel %vm1819_vm0, %v1805_v41, -1e+30  ;;  %v3651_v16 = vsel %vm1819_vm0, %v1813_v42, -1e+30 }
 0x461   : > { %v2440_v48 = vpop.f32.mrf.mxu0  ;;  %1858 = vmax.xlane.f32.xlu1 %v3638_v45  ;;  %1844 = vmax.xlane.f32.xlu0 %v3642_v46  ;;  %v2464_v50 = vpop.f32.mrf.mxu1 }
 0x462   : > { %v2441_v51 = vadd.f32 %v2440_v48, %v2439_v63  ;;  %v2465_v53 = vadd.f32 %v2464_v50, %v2463_v43  ;;  %v1806_v54 = vadd.f32 %v3578_v39, %v1783_v21  ;;  %v1814_v22 = vadd.f32 %v3578_v39, %v1791_v44 }
 0x463   : > { %v2442_v17 = vpop.f32.mrf.mxu0  ;;  %v2466_v18 = vpop.f32.mrf.mxu1 }
 0x464   : > { %v1784_v55 = vadd.f32 %v2441_v51, %v1543_v47  ;;  %v1792_v19 = vadd.f32 %v2465_v53, %v1551_v49  ;;  %v3655_v20 = vsel %vm1819_vm0, %v1806_v54, -1e+30  ;;  %v1833_v59 = vsel %vm1819_vm0, %v1814_v22, -1e+30 }
 0x465   : > { %v2443_v25 = vpop.f32.mrf.mxu0  ;;  %1846 = vmax.xlane.f32.xlu1 %v3655_v20  ;;  %1860 = vmax.xlane.f32.xlu0 %v3651_v16  ;;  %v2467_v26 = vpop.f32.mrf.mxu1 }
 0x466   : > { %v2444_v58 = vadd.f32 %v2443_v25, %v2442_v17  ;;  %v2468_v27 = vadd.f32 %v2467_v26, %v2466_v18  ;;  %v1807_v28 = vadd.f32 %v3578_v39, %v1784_v55  ;;  %v1815_v29 = vadd.f32 %v3578_v39, %v1792_v19 }
 0x468   : > { %v1785_v30 = vadd.f32 %v2444_v58, %v1544_v24  ;;  %v1793_v31 = vadd.f32 %v2468_v27, %v1552_v56  ;;  %v1826_v32 = vsel %vm1819_vm0, %v1807_v28, -1e+30  ;;  %v3671_v34 = vsel %vm1819_vm0, %v1815_v29, -1e+30 }
 0x469   : > { %1862 = vmax.xlane.f32.xlu1 %v1833_v59  ;;  %1848 = vmax.xlane.f32.xlu0 %v1826_v32 }
 0x46a   : > { %v1808_v33 = vadd.f32 %v3578_v39, %v1785_v30  ;;  %v1816_v1 = vadd.f32 %v3578_v39, %v1793_v31 }
 0x46c   : > { %v3675_v35 = vsel %vm1819_vm0, %v1808_v33, -1e+30  ;;  %v3682_v8 = vsel %vm1819_vm0, %v1816_v1, -1e+30 }
 0x46d   : > { %1850 = vmax.xlane.f32.xlu1 %v3675_v35  ;;  %1864 = vmax.xlane.f32.xlu0 %v3671_v34 }
 0x471   : > { %1866 = vmax.xlane.f32.xlu1 %v3682_v8 }
 0x4da   : > { %v1837_v9 = vpop.xlane.xlu0 %1836 }
 0x4db   : > { %v3686_v2 = vsub.f32 %v3587_v52, %v1837_v9 }
 0x4dd   : > { %v1884_v3 = vmul.f32 1.442695, %v3686_v2 }
 0x4de   : > { %v1855_v10 = vpop.xlane.xlu1 %1854  ;;  %v1853_v11 = vpop.xlane.xlu0 %1852 }
 0x4df   : > { %2807 = vpow2.f32 %v1884_v3  ;;  %v3690_v39 = vsub.f32 %v3595_v23, %v1853_v11  ;;  %v3694_v12 = vsub.f32 %v3599_v57, %v1855_v10 }
 0x4e1   : > { %v1900_v4 = vmul.f32 1.442695, %v3690_v39  ;;  %v1902_v7 = vmul.f32 1.442695, %v3694_v12 }
 0x4e2   : > { %v1841_v5 = vpop.xlane.xlu1 %1840  ;;  %v1839_v62 = vpop.xlane.xlu0 %1838 }
 0x4e3   : > { %v3697_v13 = vsub.f32 %v3610_v36, %v1841_v5  ;;  %v3700_v52 = vsub.f32 %v3614_v0, %v1839_v62  ;;  %2809 = vpow2.f32 %v1900_v4 }
 0x4e5   : > { %v1888_v60 = vmul.f32 1.442695, %v3697_v13  ;;  %v1886_v61 = vmul.f32 1.442695, %v3700_v52 }
 0x4e6   : > { %v1843_v23 = vpop.xlane.xlu1 %1842  ;;  %v1857_v6 = vpop.xlane.xlu0 %1856 }
 0x4e7   : > { %2811 = vpow2.f32 %v1888_v60  ;;  %v3706_v14 = vsub.f32 %v3627_v38, %v1843_v23  ;;  %v3709_v57 = vsub.f32 %v3623_v37, %v1857_v6 }
 0x4e8   : > { %2813 = vpow2.f32 %v1886_v61 }
 0x4e9   : > { %v1904_v36 = vmul.f32 1.442695, %v3709_v57  ;;  %2815 = vpow2.f32 %v1902_v7  ;;  %v1890_v40 = vmul.f32 1.442695, %v3706_v14 }
 0x4ea   : > { %v1859_v0 = vpop.xlane.xlu1 %1858  ;;  %v1845_v15 = vpop.xlane.xlu0 %1844 }
 0x4eb   : > { %v3714_v41 = vsub.f32 %v3638_v45, %v1859_v0  ;;  %v3717_v42 = vsub.f32 %v3642_v46, %v1845_v15  ;;  %2817 = vpow2.f32 %v1904_v36 }
 0x4ec   : > { %v2808_v63 = vpop.eup %2807  ;;  %2819 = vpow2.f32 %v1890_v40 }
 0x4ed   : > { %v1892_v38 = vmul.f32 1.442695, %v3717_v42  ;;  %1916 = vadd.xlane.f32.xlu0 %v2808_v63  ;;  %v1906_v21 = vmul.f32 1.442695, %v3714_v41 }
 0x4ee   : > { %v1847_v37 = vpop.xlane.xlu1 %1846  ;;  %v1861_v43 = vpop.xlane.xlu0 %1860 }
 0x4ef   : > { %v3722_v44 = vsub.f32 %v3655_v20, %v1847_v37  ;;  %v3725_v47 = vsub.f32 %v3651_v16, %v1861_v43  ;;  %2821 = vpow2.f32 %v1892_v38 }
 0x4f0   : > { %v2810_v45 = vpop.eup %2809  ;;  %2823 = vpow2.f32 %v1906_v21 }
 0x4f1   : > { %v1908_v46 = vmul.f32 1.442695, %v3725_v47  ;;  %1932 = vadd.xlane.f32.xlu0 %v2810_v45  ;;  %v1894_v50 = vmul.f32 1.442695, %v3722_v44 }
 0x4f2   : > { %v1863_v48 = vpop.xlane.xlu1 %1862  ;;  %v1849_v49 = vpop.xlane.xlu0 %1848 }
 0x4f3   : > { %v3729_v51 = vsub.f32 %v1833_v59, %v1863_v48  ;;  %v3731_v53 = vsub.f32 %v1826_v32, %v1849_v49  ;;  %2825 = vpow2.f32 %v1908_v46 }
 0x4f4   : > { %v2812_v54 = vpop.eup %2811  ;;  %2827 = vpow2.f32 %v1894_v50 }
 0x4f5   : > { %v2814_v17 = vpop.eup %2813  ;;  %v1896_v16 = vmul.f32 1.442695, %v3731_v53  ;;  %1920 = vadd.xlane.f32.xlu0 %v2812_v54  ;;  %v1910_v19 = vmul.f32 1.442695, %v3729_v51 }
 0x4f6   : > { %1918 = vadd.xlane.f32.xlu1 %v2814_v17  ;;  %v1851_v18 = vpop.xlane.xlu1 %1850  ;;  %v1865_v55 = vpop.xlane.xlu0 %1864 }
 0x4f7   : > { %v3736_v20 = vsub.f32 %v3671_v34, %v1865_v55  ;;  %v2816_v22 = vpop.eup %2815  ;;  %2829 = vpow2.f32 %v1896_v16  ;;  %v3739_v24 = vsub.f32 %v3675_v35, %v1851_v18 }
 0x4f8   : > { %v2818_v25 = vpop.eup %2817  ;;  %2831 = vpow2.f32 %v1910_v19 }
 0x4f9   : > { %v1912_v56 = vmul.f32 1.442695, %v3736_v20  ;;  %1936 = vadd.xlane.f32.xlu0 %v2818_v25  ;;  %v2820_v58 = vpop.eup %2819  ;;  %v1898_v27 = vmul.f32 1.442695, %v3739_v24 }
 0x4fa   : > { %1934 = vadd.xlane.f32.xlu1 %v2816_v22  ;;  %v1867_v26 = vpop.xlane.xlu1 %1866 }
 0x4fb   : > { %2833 = vpow2.f32 %v1912_v56  ;;  %v3744_v28 = vsub.f32 %v3682_v8, %v1867_v26 }
 0x4fc   : > { %v2822_v29 = vpop.eup %2821  ;;  %2835 = vpow2.f32 %v1898_v27 }
 0x4fd   : > { %1924 = vadd.xlane.f32.xlu0 %v2822_v29  ;;  %v2824_v30 = vpop.eup %2823  ;;  %v1914_v31 = vmul.f32 1.442695, %v3744_v28 }
 0x4fe   : > { %1922 = vadd.xlane.f32.xlu1 %v2820_v58 }
 0x4ff   : > { %2837 = vpow2.f32 %v1914_v31 }
 0x500   : > { %v2826_v59 = vpop.eup %2825 }
 0x501   : > { %1940 = vadd.xlane.f32.xlu0 %v2826_v59  ;;  %v2828_v32 = vpop.eup %2827 }
 0x502   : > { %1938 = vadd.xlane.f32.xlu1 %v2824_v30 }
 0x504   : > { %v2830_v33 = vpop.eup %2829 }
 0x505   : > { %1928 = vadd.xlane.f32.xlu0 %v2830_v33  ;;  %v2832_v34 = vpop.eup %2831 }
 0x506   : > { %1926 = vadd.xlane.f32.xlu1 %v2828_v32 }
 0x508   : > { %v2834_v35 = vpop.eup %2833 }
 0x509   : > { %1944 = vadd.xlane.f32.xlu0 %v2834_v35  ;;  %v2836_v1 = vpop.eup %2835 }
 0x50a   : > { %1942 = vadd.xlane.f32.xlu1 %v2832_v34 }
 0x50c   : > { %v2838_v8 = vpop.eup %2837 }
 0x50e   : > { %1930 = vadd.xlane.f32.xlu1 %v2836_v1 }
 0x512   : > { %1946 = vadd.xlane.f32.xlu1 %v2838_v8 }
 0x576   : > { %v1917_v9 = vpop.xlane.xlu0 %1916 }
 0x577   : > { %2839 = vlog2.f32 %v1917_v9 }
 0x57a   : > { %v1933_v3 = vpop.xlane.xlu0 %1932 }
 0x57b   : > { %2841 = vlog2.f32 %v1933_v3 }
 0x57e   : > { %v1921_v11 = vpop.xlane.xlu0 %1920 }
 0x57f   : > { %v1919_v10 = vpop.xlane.xlu1 %1918 }
 0x580   : > { %2843 = vlog2.f32 %v1919_v10 }
 0x581   : > { %2845 = vlog2.f32 %v1921_v11 }
 0x582   : > { %v1937_v5 = vpop.xlane.xlu0 %1936 }
 0x583   : > { %v1935_v4 = vpop.xlane.xlu1 %1934 }
 0x584   : > { %v2840_v62 = vpop.eup %2839  ;;  %2847 = vlog2.f32 %v1935_v4 }
 0x585   : > { %v1949_v60 = vmul.f32 0.6931472, %v2840_v62  ;;  %2849 = vlog2.f32 %v1937_v5 }
 0x586   : > { %v1925_v6 = vpop.xlane.xlu0 %1924 }
 0x587   : > { %v1980_v61 = vsub.f32 %v3686_v2, %v1949_v60  ;;  %v1923_v23 = vpop.xlane.xlu1 %1922 }
 0x588   : > { %2851 = vlog2.f32 %v1923_v23  ;;  %v2842_v7 = vpop.eup %2841 }
 0x589   : > { %1996 = vst [vmem:[%s3401_s22] sm:$0xff] %v1980_v61  ;;  %2853 = vlog2.f32 %v1925_v6  ;;  %v1965_v36 = vmul.f32 0.6931472, %v2842_v7 }
 0x58a   : > { %v1941_v15 = vpop.xlane.xlu0 %1940 }
 0x58b   : > { %v1939_v0 = vpop.xlane.xlu1 %1938  ;;  %v1988_v40 = vsub.f32 %v3690_v39, %v1965_v36 }
 0x58c   : > { %2855 = vlog2.f32 %v1939_v0 }
 0x58d   : > { %v2844_v63 = vpop.eup %2843  ;;  %2857 = vlog2.f32 %v1941_v15  ;;  %2004 = vst [vmem:[%s3401_s22 + $0x40] sm:$0xff] %v1988_v40 }
 0x58e   : > { %v2846_v38 = vpop.eup %2845  ;;  %v1951_v37 = vmul.f32 0.6931472, %v2844_v63  ;;  %v1929_v21 = vpop.xlane.xlu0 %1928 }
 0x58f   : > { %v1953_v2 = vmul.f32 0.6931472, %v2846_v38  ;;  %v1927_v43 = vpop.xlane.xlu1 %1926 }
 0x590   : > { %v1981_v45 = vsub.f32 %v3700_v52, %v1951_v37  ;;  %2859 = vlog2.f32 %v1927_v43 }
 0x591   : > { %v2848_v46 = vpop.eup %2847  ;;  %v1982_v48 = vsub.f32 %v3697_v13, %v1953_v2  ;;  %2861 = vlog2.f32 %v1929_v21 }
 0x592   : > { %v2850_v39 = vpop.eup %2849  ;;  %1997 = vst [vmem:[%s3401_s22 + $0x8] sm:$0xff] %v1981_v45  ;;  %v1967_v49 = vmul.f32 0.6931472, %v2848_v46  ;;  %v1945_v17 = vpop.xlane.xlu0 %1944 }
 0x593   : > { %1998 = vst [vmem:[%s3401_s22 + $0x10] sm:$0xff] %v1982_v48  ;;  %v1969_v50 = vmul.f32 0.6931472, %v2850_v39  ;;  %v1943_v54 = vpop.xlane.xlu1 %1942 }
 0x594   : > { %v1989_v16 = vsub.f32 %v3694_v12, %v1967_v49  ;;  %2863 = vlog2.f32 %v1943_v54 }
 0x595   : > { %v2852_v18 = vpop.eup %2851  ;;  %v1990_v52 = vsub.f32 %v3709_v57, %v1969_v50  ;;  %2865 = vlog2.f32 %v1945_v17 }
 0x596   : > { %v2854_v55 = vpop.eup %2853  ;;  %2005 = vst [vmem:[%s3401_s22 + $0x48] sm:$0xff] %v1989_v16  ;;  %v1955_v13 = vmul.f32 0.6931472, %v2852_v18 }
 0x597   : > { %2006 = vst [vmem:[%s3401_s22 + $0x50] sm:$0xff] %v1990_v52  ;;  %v1957_v19 = vmul.f32 0.6931472, %v2854_v55  ;;  %v1931_v22 = vpop.xlane.xlu1 %1930 }
 0x598   : > { %v1983_v25 = vsub.f32 %v3706_v14, %v1955_v13  ;;  %2867 = vlog2.f32 %v1931_v22 }
 0x599   : > { %v2856_v56 = vpop.eup %2855  ;;  %v1984_v12 = vsub.f32 %v3717_v42, %v1957_v19 }
 0x59a   : > { %v2858_v26 = vpop.eup %2857  ;;  %1999 = vst [vmem:[%s3401_s22 + $0x18] sm:$0xff] %v1983_v25  ;;  %v1971_v58 = vmul.f32 0.6931472, %v2856_v56 }
 0x59b   : > { %2000 = vst [vmem:[%s3401_s22 + $0x20] sm:$0xff] %v1984_v12  ;;  %v1973_v57 = vmul.f32 0.6931472, %v2858_v26  ;;  %v1947_v27 = vpop.xlane.xlu1 %1946 }
 0x59c   : > { %v1991_v29 = vsub.f32 %v3714_v41, %v1971_v58  ;;  %2869 = vlog2.f32 %v1947_v27 }
 0x59d   : > { %v2860_v30 = vpop.eup %2859  ;;  %v1992_v31 = vsub.f32 %v3725_v47, %v1973_v57 }
 0x59e   : > { %v2862_v14 = vpop.eup %2861  ;;  %2007 = vst [vmem:[%s3401_s22 + $0x58] sm:$0xff] %v1991_v29  ;;  %v1959_v59 = vmul.f32 0.6931472, %v2860_v30 }
 0x59f   : > { %2008 = vst [vmem:[%s3401_s22 + $0x60] sm:$0xff] %v1992_v31  ;;  %v1961_v42 = vmul.f32 0.6931472, %v2862_v14 }
 0x5a0   : > { %v1985_v32 = vsub.f32 %v3722_v44, %v1959_v59 }
 0x5a1   : > { %v2864_v33 = vpop.eup %2863  ;;  %v1986_v34 = vsub.f32 %v3731_v53, %v1961_v42 }
 0x5a2   : > { %v2866_v35 = vpop.eup %2865  ;;  %2001 = vst [vmem:[%s3401_s22 + $0x28] sm:$0xff] %v1985_v32  ;;  %v1975_v41 = vmul.f32 0.6931472, %v2864_v33 }
 0x5a3   : > { %2002 = vst [vmem:[%s3401_s22 + $0x30] sm:$0xff] %v1986_v34  ;;  %v1977_v1 = vmul.f32 0.6931472, %v2866_v35 }
 0x5a4   : > { %v1993_v47 = vsub.f32 %v3729_v51, %v1975_v41 }
 0x5a5   : > { %v2868_v8 = vpop.eup %2867  ;;  %v1994_v9 = vsub.f32 %v3736_v20, %v1977_v1 }
 0x5a6   : > { %2009 = vst [vmem:[%s3401_s22 + $0x68] sm:$0xff] %v1993_v47  ;;  %v1963_v3 = vmul.f32 0.6931472, %v2868_v8 }
 0x5a7   : > { %2010 = vst [vmem:[%s3401_s22 + $0x70] sm:$0xff] %v1994_v9 }
 0x5a8   : > { %v1987_v44 = vsub.f32 %v3739_v24, %v1963_v3 }
 0x5a9   : > { %v2870_v10 = vpop.eup %2869 }
 0x5aa   : > { %2003 = vst [vmem:[%s3401_s22 + $0x38] sm:$0xff] %v1987_v44  ;;  %v1979_v11 = vmul.f32 0.6931472, %v2870_v10 }
 0x5ac   : > { %v1995_v53 = vsub.f32 %v3744_v28, %v1979_v11 }
 0x5ae   : > { %2011 = vst [vmem:[%s3401_s22 + $0x78] sm:$0xff] %v1995_v53 }
 0x5af PF: > { %s2276_s13 = sshll.u32 %s3119_s30, 11  ;;  %s2026_s1 = sshll.u32 %s3401_s22, 4  ;;  %s3786_s1 = int_to_ptr.vmem [resolvable:$true] %s2026_s1 }
 0x5b0   : > { %s3783_s25 = scalar_lea.hbm %s3849_s8, %s2276_s13  ;;  %s3790_s11 = scalar_lea.sflag [#allocation6], %s381_s26 }
 0x5b1   : > { %s3027_s24 = scalar_lea.vmem %s3786_s1, 2048  ;;  %p3874_p1 = scmp.ne.s32.totalorder %s3863_s19, 0 }
 0x5b2   : > { %p3028_p0 = scmp.ne.s32.totalorder %s3786_s1, %s3027_s24  ;;  %s3147_s30 = smov [#allocation15]  }
 0x5b3   : > { %s3031_s3 = sshll.u32 %s3147_s30, 4  ;;  %s3032_s3 = int_to_ptr.vmem [resolvable:$false] %s3031_s3 }
 0x5b4   : > { %p3029_p10 = pnand %p3028_p0, %p3874_p1  ;;  %s3033_s10 = scalar_lea.vmem %s3032_s3, 4096 }
 0x5b5   : > { %p3034_p13 = scmp.lt.s32.totalorder %s3786_s1, %s3032_s3  ;;  %p3035_p4 = scmp.lt.s32.totalorder %s3033_s10, %s3027_s24 }
 0x5b6   : > { %p3030_p2 = pneg %p3029_p10 }
 0x5b7   : > { %p3036_p6 = por %p3035_p4, %p3034_p13 }
 0x5b9   : > { %p3037_p3 = pnand %p3036_p6, %p3030_p2 }
 0x5bb   : > { %3040 = shalt.err (!%p3037_p3)
}
 0x5bc   : > { %s3041_s26 = scalar_lea.hbm %s3783_s25, 2048  ;;  %s3045_s18 = scalar_lea.hbm %s3849_s8, 4096 }
 0x5bd   : > { %p3042_p8 = scmp.ne.s32.totalorder %s3783_s25, %s3041_s26  ;;  %p3046_p9 = scmp.lt.s32.totalorder %s3783_s25, %s3849_s8 }
 0x5be   : > { %p3047_p11 = scmp.lt.s32.totalorder %s3045_s18, %s3041_s26 }
 0x5bf   : > { %p3043_p5 = pnand %p3042_p8, %p3874_p1 }
 0x5c0   : > { %p3048_p12 = por %p3047_p11, %p3046_p9 }
 0x5c1   : > { %p3044_p7 = pneg %p3043_p5 }
 0x5c3   : > { %p3049_p0 = pnand %p3048_p12, %p3044_p7 }
 0x5c5   : > { %3052 = shalt.err (!%p3049_p0)
}
 0x5c6   : > { %s3148_s16 = smov 128   ;;  %s3149_s13 = smov 8  }
 0x5c7   : > { %2637 = dma.vmem_to_hbm [thread:$0]  (%p3874_p1), %s3786_s1, 2048, %s3783_s25, %s3790_s11, %s3148_s16, %s3148_s16, %s3149_s13  }
 0x5c8 PF: > { %p2674_p10 = scmp.ge.s32.totalorder %s3135_s12, 2  ;;  %s2041_s23 = sand.u32 1, %s3107_s27  }
 0x5c9   : > { %p3875_p2 = scmp.ne.s32.totalorder %s3865_s21, 0  ;;  %s2042_s17 = scalar_lea.sflag [#allocation6], %s2041_s23 }
 0x5cb   : > { %p2659_p13 = pnand %p2674_p10, %p3875_p2 }
 0x5cd   : > { %p2660_p4 = pneg %p2659_p13 }
 0x5cf   : > { %3102 = dma.done.wait (%p2660_p4), %s2042_s17, 2048  }
 0x5d0   : > { %3104 = vsyncadd (%p2660_p4), %s2042_s17, 4294965248  ;;  %s25_s12 = sadd.s32 1, %s3135_s12   ;;  %s3876_s30 = sld [smem:[#allocation21_spill]] }
 0x5d1   : > { %p22_p6 = scmp.ge.s32.totalorder %s25_s12, 6   ;;  %s3877_s9 = sld [smem:[#allocation22_spill]] }
 0x5d2   : > { %s3878_s10 = sld [smem:[#allocation23_spill]]  ;;  %s3880_s27 = smov %s3111_s28 }
 0x5d3   : > { %s3879_s11 = sld [smem:[#allocation24_spill]]  ;;  %s3881_s28 = smov %s3115_s29 }
 0x5d4   : > { %s3882_s29 = smov %s3256_s20  ;;  %24 = sbr.rel (!%p22_p6) target bundleno = 12 (0xc), region = 122 }
 0x5d9   :  { %2047 = vsyncpa [#allocation5], 1 }
 0x5da   :  { %2049 = vsyncpa [#allocation5 + $0x1], 1 }
 0x5db   :  { %2050 = vsyncpa [#allocation8], 1 }
 0x5dc   :  { %2051 = vsyncpa [#allocation11], 1 }
 0x5dd   :  { %2052 = vsyncpa [#allocation14], 1 }
 0x5de   :  { %2053 = vsyncpa [#allocation6], 1 }
 0x5df   :  { %2055 = vsyncpa [#allocation6 + $0x1], 1 }

</bundles_post_ra>
